<compile_context>
chip_gen: v7x
topology: tpu7x:2x2x1
jax: 0.10.0
libtpu: 0.0.40
codegen_flags: <defaults>
</compile_context>

<pallas_src>
import jax
import jax.numpy as jnp
from jax import lax
from jax.experimental import pallas as pl
from jax.experimental.pallas import tpu as pltpu

_INV_SQRT2 = 0.7071067811865476


def _erf_approx(x):
    # Abramowitz & Stegun 7.1.26 rational approximation, |error| <= 1.5e-7.
    # Only uses ops guaranteed to lower on Mosaic (exp goes to the EUP slot).
    t = 1.0 / (1.0 + 0.3275911 * jnp.abs(x))
    poly = t * (0.254829592 + t * (-0.284496736 + t * (1.421413741
               + t * (-1.453152027 + t * 1.061405429))))
    y = 1.0 - poly * jnp.exp(-(x * x))
    return jnp.where(x < 0.0, -y, y)


def _gelu_exact(x):
    # PyTorch nn.GELU default (erf-based), exact to ~1.5e-7.
    return 0.5 * x * (1.0 + _erf_approx(x * _INV_SQRT2))


# ----------------------------------------------------------------------------
# Fused kernel: one (batch, HW-tile) step computes
#   out[Cout, tHW] = W2 @ gelu(W1 @ x[Cin, tHW] + b1) + b2
# ----------------------------------------------------------------------------
def _mlp_kernel(x_ref, w1_ref, b1_ref, w2_ref, b2_ref, o_ref):
    x = x_ref[...].astype(jnp.bfloat16)                       # [Cin, tHW]
    h = jnp.dot(w1_ref[...], x,
                preferred_element_type=jnp.float32)           # [Hid, tHW] f32
    h = h + b1_ref[...]                                       # + [Hid, 1]
    h = _gelu_exact(h)
    o = jnp.dot(w2_ref[...], h.astype(jnp.bfloat16),
                preferred_element_type=jnp.float32)           # [Cout, tHW] f32
    o = o + b2_ref[...]                                       # + [Cout, 1]
    o_ref[...] = o.astype(o_ref.dtype)


def _choose_tile_hw(HW, cap):
    """Pick a lane-dense HW tile: full extent if small, else a multiple of 128
    dividing HW; padding is only a last-resort fallback."""
    if HW <= cap:
        return HW, HW                           # full extent -> always legal
    max128 = max(128, (cap // 128) * 128)
    for tn in range(max128, 127, -128):
        if HW % tn == 0:
            return tn, HW
    tn = max128                                  # rare fallback: pad HW axis
    return tn, pl.cdiv(HW, tn) * tn


def _vmem_budget_bytes():
    # v5e/v6e: 128 MiB physical VMEM; v7x: 64 MiB.  Keep ~25% headroom for
    # compiler-internal scratch (important on v7x).
    try:
        cap = pltpu.get_tpu_info().vmem_capacity_bytes
    except Exception:
        cap = 64 * 1024 * 1024
    return int(cap * 3 // 4)


# ----------------------------------------------------------------------------
# Module-level forward (NCHW in / NCHW out, like the PyTorch module)
# ----------------------------------------------------------------------------
def mlp_forward(params, x, *, tile_hw=2048):
    B, C, H, W = x.shape
    HW = H * W
    w1, b1 = params['w1'], params['b1']          # w1: [Hid, Cin] (torch layout)
    w2, b2 = params['w2'], params['b2']          # w2: [Cout, Hid]
    Hid, Cin = w1.shape
    Cout = w2.shape[0]
    assert Cin == C

    x3 = x.reshape(B, C, HW)                     # free reshape of NCHW
    tn, HWp = _choose_tile_hw(HW, tile_hw)
    if HWp != HW:                                # rare fallback only
        x3 = jnp.pad(x3, ((0, 0), (0, 0), (0, HWp - HW)))
    grid = (B, HWp // tn)

    w1b = w1.astype(jnp.bfloat16)
    w2b = w2.astype(jnp.bfloat16)
    b1c = b1.reshape(Hid, 1).astype(jnp.float32)
    b2c = b2.reshape(Cout, 1).astype(jnp.float32)

    # Single-buffer the grid-invariant weights only when they are big enough
    # to matter for VMEM (mainly v7x's 64 MiB budget); no-op for small MLPs.
    w_kw = ({"pipeline_mode": pl.Buffered(1)}
            if (Hid * Cin + Cout * Hid) * 2 > (2 << 20) else {})

    # VMEM from actual blocks: 2x-buffered x/out tiles + weights/biases +
    # the f32 [Hid, tHW] intermediate (plus bf16 copy).
    est = (2 * C * tn * 4 + 2 * Cout * tn * 4
           + 2 * ((Hid * Cin + Cout * Hid) * 2 + (Hid + Cout) * 4)
           + 2 * Hid * tn * 4)
    vmem_limit = int(min(max(2 * est, 32 << 20), _vmem_budget_bytes()))

    y3 = pl.pallas_call(
        _mlp_kernel,
        out_shape=jax.ShapeDtypeStruct((B, Cout, HWp), jnp.float32),
        grid=grid,
        in_specs=[
            pl.BlockSpec((None, C, tn), lambda b, n: (b, 0, n)),       # x tile
            pl.BlockSpec((Hid, Cin), lambda b, n: (0, 0), **w_kw),     # W1
            pl.BlockSpec((Hid, 1), lambda b, n: (0, 0)),               # b1
            pl.BlockSpec((Cout, Hid), lambda b, n: (0, 0), **w_kw),    # W2
            pl.BlockSpec((Cout, 1), lambda b, n: (0, 0)),              # b2
        ],
        out_specs=pl.BlockSpec((None, Cout, tn), lambda b, n: (b, 0, n)),
        compiler_params=pltpu.CompilerParams(
            dimension_semantics=("parallel", "parallel"),
            vmem_limit_bytes=vmem_limit,
        ),
    )(x3, w1b, b1c, w2b, b2c)

    if HWp != HW:
        y3 = y3[:, :, :HW]
    return y3.reshape(B, Cout, H, W)             # free reshape back to NCHW


def mlp_forward_ref(params, x):
    # Pure-JAX f32 reference with exact (erf) GELU, NCHW throughout
    # (channel contraction == permute + Linear + permute in the PyTorch code).
    hp = lax.Precision.HIGHEST
    h = jnp.einsum('bchw,dc->bdhw', x, params['w1'], precision=hp)
    h = h + params['b1'][None, :, None, None]
    h = 0.5 * h * (1.0 + lax.erf(h * _INV_SQRT2))
    o = jnp.einsum('bdhw,ed->behw', h, params['w2'], precision=hp)
    o = o + params['b2'][None, :, None, None]
    return o


# ----------------------------------------------------------------------------
# Deterministic parameter init (trunc-normal std=0.02 weights, zero bias),
# weights kept in PyTorch nn.Linear [out_features, in_features] layout.
# ----------------------------------------------------------------------------
def init_params(key, in_features, hidden_features, out_features):
    k1, k2 = jax.random.split(key, 2)
    w1 = 0.02 * jax.random.truncated_normal(
        k1, -2.0, 2.0, (hidden_features, in_features), jnp.float32)
    w2 = 0.02 * jax.random.truncated_normal(
        k2, -2.0, 2.0, (out_features, hidden_features), jnp.float32)
    return {
        'w1': w1, 'b1': jnp.zeros((hidden_features,), jnp.float32),
        'w2': w2, 'b2': jnp.zeros((out_features,), jnp.float32),
    }


if __name__ == "__main__":
    B, C, H, W = 2, 32, 16, 16
    hidden, out_dim = 128, 32

    key = jax.random.PRNGKey(0)
    kx, kp = jax.random.split(key, 2)
    x = jax.random.normal(kx, (B, C, H, W), jnp.float32)
    params = init_params(kp, C, hidden, out_dim)

    out = jax.block_until_ready(jax.jit(mlp_forward)(params, x))
    ref = jax.block_until_ready(mlp_forward_ref(params, x))

    assert out.shape == (B, out_dim, H, W), out.shape
    assert bool(jnp.all(jnp.isfinite(out)))
    max_err = float(jnp.max(jnp.abs(out - ref)))
    # bf16 MXU operands with f32 accumulation: allow bf16-level quantization.
    assert max_err < 2e-3, max_err
    print("KERNEL_OK")
</pallas_src>

<mosaic_0001>
module attributes {stable_mosaic.version = 11 : i64} {
  func.func @_mlp_kernel(%arg0: i32, %arg1: i32, %arg2: memref<1x32x256xf32, #tpu.memory_space<vmem>>, %arg3: memref<128x32xbf16, #tpu.memory_space<vmem>>, %arg4: memref<128x1xf32, #tpu.memory_space<vmem>>, %arg5: memref<32x128xbf16, #tpu.memory_space<vmem>>, %arg6: memref<32x1xf32, #tpu.memory_space<vmem>>, %arg7: memref<1x32x256xf32, #tpu.memory_space<vmem>>) attributes {dimension_semantics = [#tpu.dimension_semantics<parallel>, #tpu.dimension_semantics<parallel>], iteration_bounds = array<i64: 2, 1>, scalar_prefetch = 0 : i64, scratch_operands = 0 : i64, tpu.core_type = #tpu.core_type<tc>, window_params = [{transform_indices = @transform_0, window_bounds = array<i64: 1, 32, 256>}, {pipeline_mode = #tpu.pipeline_mode<synchronous>, transform_indices = @transform_1, window_bounds = array<i64: 128, 32>}, {pipeline_mode = #tpu.pipeline_mode<synchronous>, transform_indices = @transform_2, window_bounds = array<i64: 128, 1>}, {pipeline_mode = #tpu.pipeline_mode<synchronous>, transform_indices = @transform_3, window_bounds = array<i64: 32, 128>}, {pipeline_mode = #tpu.pipeline_mode<synchronous>, transform_indices = @transform_4, window_bounds = array<i64: 32, 1>}, {transform_indices = @transform_5, window_bounds = array<i64: 1, 32, 256>}]} {
    %c0 = arith.constant 0 : index
    %c0_0 = arith.constant 0 : index
    %c0_1 = arith.constant 0 : index
    %0 = vector.load %arg2[%c0, %c0_0, %c0_1] : memref<1x32x256xf32, #tpu.memory_space<vmem>>, vector<1x32x256xf32>
    %1 = vector.shape_cast %0 : vector<1x32x256xf32> to vector<32x256xf32>
    %2 = arith.truncf %1 : vector<32x256xf32> to vector<32x256xbf16>
    %c0_2 = arith.constant 0 : index
    %c0_3 = arith.constant 0 : index
    %3 = vector.load %arg3[%c0_2, %c0_3] : memref<128x32xbf16, #tpu.memory_space<vmem>>, vector<128x32xbf16>
    %cst = arith.constant dense<0.000000e+00> : vector<128x256xf32>
    %4 = tpu.matmul %3, %2, %cst {dimension_numbers = #tpu.dot_dimension_numbers<[1], [0], [0], [1], [0, 0, 1, 1], [], []>} : vector<128x32xbf16>, vector<32x256xbf16>, vector<128x256xf32> -> vector<128x256xf32>
    %c0_4 = arith.constant 0 : index
    %c0_5 = arith.constant 0 : index
    %5 = vector.load %arg4[%c0_4, %c0_5] : memref<128x1xf32, #tpu.memory_space<vmem>>, vector<128x1xf32>
    %6 = vector.broadcast %5 : vector<128x1xf32> to vector<128x256xf32>
    %7 = arith.addf %4, %6 : vector<128x256xf32>
    %cst_6 = arith.constant 5.000000e-01 : f32
    %8 = vector.broadcast %cst_6 : f32 to vector<128x256xf32>
    %9 = arith.mulf %8, %7 : vector<128x256xf32>
    %cst_7 = arith.constant 0.707106769 : f32
    %10 = vector.broadcast %cst_7 : f32 to vector<128x256xf32>
    %11 = arith.mulf %7, %10 : vector<128x256xf32>
    %12 = math.absf %11 : vector<128x256xf32>
    %cst_8 = arith.constant 0.327591091 : f32
    %13 = vector.broadcast %cst_8 : f32 to vector<128x256xf32>
    %14 = arith.mulf %13, %12 : vector<128x256xf32>
    %cst_9 = arith.constant 1.000000e+00 : f32
    %15 = vector.broadcast %cst_9 : f32 to vector<128x256xf32>
    %16 = arith.addf %15, %14 : vector<128x256xf32>
    %cst_10 = arith.constant 1.000000e+00 : f32
    %17 = vector.broadcast %cst_10 : f32 to vector<128x256xf32>
    %18 = arith.divf %17, %16 : vector<128x256xf32>
    %cst_11 = arith.constant 1.06140542 : f32
    %19 = vector.broadcast %cst_11 : f32 to vector<128x256xf32>
    %20 = arith.mulf %18, %19 : vector<128x256xf32>
    %cst_12 = arith.constant -1.45315206 : f32
    %21 = vector.broadcast %cst_12 : f32 to vector<128x256xf32>
    %22 = arith.addf %21, %20 : vector<128x256xf32>
    %23 = arith.mulf %18, %22 : vector<128x256xf32>
    %cst_13 = arith.constant 1.42141378 : f32
    %24 = vector.broadcast %cst_13 : f32 to vector<128x256xf32>
    %25 = arith.addf %24, %23 : vector<128x256xf32>
    %26 = arith.mulf %18, %25 : vector<128x256xf32>
    %cst_14 = arith.constant -0.284496725 : f32
    %27 = vector.broadcast %cst_14 : f32 to vector<128x256xf32>
    %28 = arith.addf %27, %26 : vector<128x256xf32>
    %29 = arith.mulf %18, %28 : vector<128x256xf32>
    %cst_15 = arith.constant 0.254829586 : f32
    %30 = vector.broadcast %cst_15 : f32 to vector<128x256xf32>
    %31 = arith.addf %30, %29 : vector<128x256xf32>
    %32 = arith.mulf %18, %31 : vector<128x256xf32>
    %33 = arith.mulf %11, %11 : vector<128x256xf32>
    %cst_16 = arith.constant 0.000000e+00 : f32
    %34 = vector.broadcast %cst_16 : f32 to vector<128x256xf32>
    %35 = arith.subf %34, %33 : vector<128x256xf32>
    %36 = math.exp %35 : vector<128x256xf32>
    %37 = arith.mulf %32, %36 : vector<128x256xf32>
    %cst_17 = arith.constant 1.000000e+00 : f32
    %38 = vector.broadcast %cst_17 : f32 to vector<128x256xf32>
    %39 = arith.subf %38, %37 : vector<128x256xf32>
    %cst_18 = arith.constant 0.000000e+00 : f32
    %40 = vector.broadcast %cst_18 : f32 to vector<128x256xf32>
    %41 = arith.cmpf olt, %11, %40 : vector<128x256xf32>
    %cst_19 = arith.constant 0.000000e+00 : f32
    %42 = vector.broadcast %cst_19 : f32 to vector<128x256xf32>
    %43 = arith.subf %42, %39 : vector<128x256xf32>
    %44 = arith.select %41, %43, %39 : vector<128x256xi1>, vector<128x256xf32>
    %cst_20 = arith.constant 1.000000e+00 : f32
    %45 = vector.broadcast %cst_20 : f32 to vector<128x256xf32>
    %46 = arith.addf %45, %44 : vector<128x256xf32>
    %47 = arith.mulf %9, %46 : vector<128x256xf32>
    %c0_21 = arith.constant 0 : index
    %c0_22 = arith.constant 0 : index
    %48 = vector.load %arg5[%c0_21, %c0_22] : memref<32x128xbf16, #tpu.memory_space<vmem>>, vector<32x128xbf16>
    %49 = arith.truncf %47 : vector<128x256xf32> to vector<128x256xbf16>
    %cst_23 = arith.constant dense<0.000000e+00> : vector<32x256xf32>
    %50 = tpu.matmul %48, %49, %cst_23 {dimension_numbers = #tpu.dot_dimension_numbers<[1], [0], [0], [1], [0, 0, 1, 1], [], []>} : vector<32x128xbf16>, vector<128x256xbf16>, vector<32x256xf32> -> vector<32x256xf32>
    %c0_24 = arith.constant 0 : index
    %c0_25 = arith.constant 0 : index
    %51 = vector.load %arg6[%c0_24, %c0_25] : memref<32x1xf32, #tpu.memory_space<vmem>>, vector<32x1xf32>
    %52 = vector.broadcast %51 : vector<32x1xf32> to vector<32x256xf32>
    %53 = arith.addf %50, %52 : vector<32x256xf32>
    %c0_26 = arith.constant 0 : index
    %c0_27 = arith.constant 0 : index
    %c0_28 = arith.constant 0 : index
    %54 = vector.load %arg7[%c0_26, %c0_27, %c0_28] : memref<1x32x256xf32, #tpu.memory_space<vmem>>, vector<1x32x256xf32>
    %55 = vector.shape_cast %54 : vector<1x32x256xf32> to vector<32x256xf32>
    %56 = vector.shape_cast %53 : vector<32x256xf32> to vector<1x32x256xf32>
    tpu.vector_store %arg7[%c0_26, %c0_27, %c0_28], %56 {strides = array<i32>} : memref<1x32x256xf32, #tpu.memory_space<vmem>>, vector<1x32x256xf32>,
    return
  }
  func.func @transform_0(%arg0: i32, %arg1: i32) -> (i32, i32, i32) {
    %c0_i32 = arith.constant 0 : i32
    %c0_i32_0 = arith.constant 0 : i32
    return %arg0, %c0_i32, %arg1 : i32, i32, i32
  }
  func.func @transform_1(%arg0: i32, %arg1: i32) -> (i32, i32) {
    %c0_i32 = arith.constant 0 : i32
    %c0_i32_0 = arith.constant 0 : i32
    %c0_i32_1 = arith.constant 0 : i32
    return %c0_i32, %c0_i32_0 : i32, i32
  }
  func.func @transform_2(%arg0: i32, %arg1: i32) -> (i32, i32) {
    %c0_i32 = arith.constant 0 : i32
    %c0_i32_0 = arith.constant 0 : i32
    %c0_i32_1 = arith.constant 0 : i32
    return %c0_i32, %c0_i32_0 : i32, i32
  }
  func.func @transform_3(%arg0: i32, %arg1: i32) -> (i32, i32) {
    %c0_i32 = arith.constant 0 : i32
    %c0_i32_0 = arith.constant 0 : i32
    %c0_i32_1 = arith.constant 0 : i32
    return %c0_i32, %c0_i32_0 : i32, i32
  }
  func.func @transform_4(%arg0: i32, %arg1: i32) -> (i32, i32) {
    %c0_i32 = arith.constant 0 : i32
    %c0_i32_0 = arith.constant 0 : i32
    %c0_i32_1 = arith.constant 0 : i32
    return %c0_i32, %c0_i32_0 : i32, i32
  }
  func.func @transform_5(%arg0: i32, %arg1: i32) -> (i32, i32, i32) {
    %c0_i32 = arith.constant 0 : i32
    %c0_i32_0 = arith.constant 0 : i32
    return %arg0, %c0_i32, %arg1 : i32, i32, i32
  }
}

</mosaic_0001>

<bundles_post_ra>
// kernel: mlp_forward.1
= control target key start
LH: loop header
LB: loop body
LE: loop exit
PB: predicated region body
PF: predicated region fallthrough
CT: control target
= control target key end

     0   :  { %s1886_s18 = smov 0   ;;  %s1888_s19 = smov 0   ;;  %s2910_s0 = inlined_call_operand.vmem [shape: f32[2,32,256], index: 0, kind: input, shape index: {}]   ;;  %s2911_s1 = inlined_call_operand.vmem [shape: bf16[128,32], index: 1, kind: input, shape index: {}]   ;;  %s2912_s2 = inlined_call_operand.vmem [shape: f32[128,1], index: 2, kind: input, shape index: {}]   ;;  %s2913_s3 = inlined_call_operand.vmem [shape: bf16[32,128], index: 3, kind: input, shape index: {}]   ;;  %s2914_s4 = inlined_call_operand.vmem [shape: f32[32,1], index: 4, kind: input, shape index: {}]   ;;  %s2915_s5 = inlined_call_operand.vmem [shape: f32[2,32,256], index: 5, kind: output, shape index: {}]  }
   0x1   :  { %s1890_s20 = smov 0  }
   0x2 LB: > { %s27_s21 = sadd.s32 1, %s1849_s19  ;;  %p1639_p0 = scmp.ge.s32.totalorder %s1853_s20, 1  ;;  %s1853_s20 = sphi %s1890_s20, %s15_s20   ;;  %s1849_s19 = sphi %s1888_s19, %s2998_s19   ;;  %s1845_s18 = sphi %s1886_s18, %s2997_s18  }
   0x3   : > { %p29_p1 = scmp.ge.s32.totalorder %s27_s21, 2  ;;  %p208_p2 = scmp.lt.s32.totalorder %s1853_s20, 3 }
   0x5   : > { %s3000_s21 = smov (%p29_p1, %s27_s21), 0  ;;  %p209_p3 = pnand %p1639_p0, %p208_p2 }
   0x7   : > { %212 = sbr.rel (%p209_p3) target bundleno = 718 (0x2ce), region = 40 }
   0xe   : > { %p245_p4 = scmp.lt.s32.totalorder %s1845_s18, 1  ;;  %v2916_v0 = vmov 0   ;;  %v293_v13 = vld [vmem:[%s2912_s2] sm:$0xff]  ;;  %v295_v14 = vld [vmem:[%s2912_s2 + $0x10] sm:$0xff]  ;;  %v294_v16 = vld [vmem:[%s2912_s2 + $0x8] sm:$0xff]  ;;  %vm429_vm0 = vcmask 261120  }
   0xf   : > { %486 = vmatprep.mubr.bf16.mxu0 %v2916_v0  ;;  %1691 = vset.pattern.permute.xlu0 %v2916_v0  ;;  %v1693_v15 = vld [vmem:[%s2911_s1] sm:$0xff]   ;;  %v296_v17 = vld [vmem:[%s2912_s2 + $0x18] sm:$0xff]  ;;  %v298_v19 = vld [vmem:[%s2912_s2 + $0x28] sm:$0xff] }
  0x10   : > { %s3002_s18 = smov (!%p245_p4, %s1845_s18), 1  ;;  %1692 = vset.pattern.permute.xlu1 %v2916_v0  ;;  %1519 = vmatprep.mubr.bf16.mxu1 %v2916_v0  ;;  %v297_v18 = vld [vmem:[%s2912_s2 + $0x20] sm:$0xff]  ;;  %v1694_v20 = vld [vmem:[%s2911_s1 + $0x8] sm:$0xff]   ;;  %v299_v21 = vld [vmem:[%s2912_s2 + $0x30] sm:$0xff] }
  0x11   : > { %s1664_s22 = sshll.u32 %s3002_s18, 6  ;;  %311 = vperm.xlu0 %1691, %v293_v13   ;;  %321 = vperm.xlu1 %1692, %v295_v14   ;;  %v300_v22 = vld [vmem:[%s2912_s2 + $0x38] sm:$0xff]  ;;  %v301_v23 = vld [vmem:[%s2912_s2 + $0x40] sm:$0xff]  ;;  %v302_v24 = vld [vmem:[%s2912_s2 + $0x48] sm:$0xff] }
  0x12   : > { %s252_s25 = scalar_lea.vmem %s2910_s0, %s1664_s22  ;;  %v1695_v25 = vld [vmem:[%s2911_s1 + $0x10] sm:$0xff]   ;;  %v304_v27 = vld [vmem:[%s2912_s2 + $0x58] sm:$0xff]  ;;  %v305_v28 = vld [vmem:[%s2912_s2 + $0x60] sm:$0xff]  ;;  %s262_s28 = scalar_lea.vmem %s2915_s5, %s1664_s22 }
  0x13   : > { %v266_v1 = vld [vmem:[%s252_s25 + $0x8] sm:$0xff]  ;;  %v268_v2 = vld [vmem:[%s252_s25 + $0x18] sm:$0xff]  ;;  %v265_v3 = vld [vmem:[%s252_s25] sm:$0xff] }
  0x14   : > { %v274_v4 = vpack.c.bf16 %v268_v2, %v266_v1  ;;  %v267_v5 = vld [vmem:[%s252_s25 + $0x10] sm:$0xff]  ;;  %v270_v6 = vld [vmem:[%s252_s25 + $0x28] sm:$0xff]  ;;  %v272_v7 = vld [vmem:[%s252_s25 + $0x38] sm:$0xff] }
  0x15   : > { %v273_v8 = vpack.c.bf16 %v267_v5, %v265_v3  ;;  %v276_v9 = vpack.c.bf16 %v272_v7, %v270_v6  ;;  %v269_v10 = vld [vmem:[%s252_s25 + $0x20] sm:$0xff]  ;;  %v271_v11 = vld [vmem:[%s252_s25 + $0x30] sm:$0xff]  ;;  %316 = vperm.xlu0 %1691, %v294_v16   ;;  %326 = vperm.xlu1 %1692, %v296_v17   ;;  %v306_v29 = vld [vmem:[%s2912_s2 + $0x68] sm:$0xff] }
  0x16   : > { %454 = vmatprep.subr.bf16.mxu0 %v274_v4  ;;  %v275_v12 = vpack.c.bf16 %v271_v11, %v269_v10  ;;  %v303_v26 = vld [vmem:[%s2912_s2 + $0x50] sm:$0xff]  ;;  %v1696_v30 = vld [vmem:[%s2911_s1 + $0x18] sm:$0xff]   ;;  %v1451_v33 = vld [vmem:[%s2914_s4] sm:$0xff] }
  0x17   : > { %455 = vmatpush1.bf16.msra.mxu0 %v273_v8  ;;  %v307_v31 = vld [vmem:[%s2912_s2 + $0x70] sm:$0xff]  ;;  %v308_v32 = vld [vmem:[%s2912_s2 + $0x78] sm:$0xff]  ;;  %v1452_v34 = vld [vmem:[%s2914_s4 + $0x8] sm:$0xff] }
  0x18   : > { %456 = vmatprep.subr.bf16.mxu0 %v276_v9  ;;  %v1697_v35 = vld [vmem:[%s2911_s1 + $0x20] sm:$0xff]   ;;  %v1453_v36 = vld [vmem:[%s2914_s4 + $0x10] sm:$0xff]  ;;  %v1454_v37 = vld [vmem:[%s2914_s4 + $0x18] sm:$0xff] }
  0x19   : > { %331 = vperm.xlu0 %1691, %v297_v18   ;;  %336 = vperm.xlu1 %1692, %v298_v19   ;;  %v1698_v38 = vld [vmem:[%s2911_s1 + $0x28] sm:$0xff]   ;;  %v1699_v39 = vld [vmem:[%s2911_s1 + $0x30] sm:$0xff]   ;;  %v1700_v40 = vld [vmem:[%s2911_s1 + $0x38] sm:$0xff]  }
  0x1b   : > { %457 = vmatpush1.bf16.msra.mxu0 %v275_v12 }
  0x1d   : > { %341 = vperm.xlu0 %1691, %v299_v21   ;;  %346 = vperm.xlu1 %1692, %v300_v22  }
  0x1e   : > { %1652 = vmatmul.mubr.msk.bf16.vlgmr.msra.gmra.mrb[0].mxu0 %vm429_vm0, %v1693_v15 }
  0x1f   : > { %496 = vmatprep.mubr.bf16.mxu0 %v2916_v0 }
  0x21   : > { %351 = vperm.xlu0 %1691, %v301_v23   ;;  %356 = vperm.xlu1 %1692, %v302_v24  }
  0x25   : > { %361 = vperm.xlu0 %1691, %v303_v26   ;;  %366 = vperm.xlu1 %1692, %v304_v27  }
  0x26   : > { %1653 = vmatmul.mubr.msk.bf16.gmra.mrb[4].mxu0 %vm429_vm0, %v1694_v20 }
  0x27   : > { %506 = vmatprep.mubr.bf16.mxu0 %v2916_v0 }
  0x29   : > { %371 = vperm.xlu0 %1691, %v305_v28   ;;  %376 = vperm.xlu1 %1692, %v306_v29  }
  0x2d   : > { %381 = vperm.xlu0 %1691, %v307_v31   ;;  %386 = vperm.xlu1 %1692, %v308_v32  }
  0x2e   : > { %1654 = vmatmul.mubr.msk.bf16.gmra.mrb[8].mxu0 %vm429_vm0, %v1695_v25 }
  0x2f   : > { %516 = vmatprep.mubr.bf16.mxu0 %v2916_v0 }
  0x31   : > { %1457 = vperm.xlu0 %1691, %v1451_v33   ;;  %1462 = vperm.xlu1 %1692, %v1452_v34  }
  0x35   : > { %1467 = vperm.xlu0 %1691, %v1453_v36   ;;  %1472 = vperm.xlu1 %1692, %v1454_v37  }
  0x36   : > { %1655 = vmatmul.mubr.msk.bf16.gmra.mrb[12].mxu0 %vm429_vm0, %v1696_v30 }
  0x37   : > { %526 = vmatprep.mubr.bf16.mxu0 %v2916_v0 }
  0x3e   : > { %1656 = vmatmul.mubr.msk.bf16.gmra.mrb[16].mxu0 %vm429_vm0, %v1697_v35 }
  0x3f   : > { %536 = vmatprep.mubr.bf16.mxu0 %v2916_v0 }
  0x46   : > { %1657 = vmatmul.mubr.msk.bf16.gmra.mrb[20].mxu0 %vm429_vm0, %v1698_v38 }
  0x47   : > { %546 = vmatprep.mubr.bf16.mxu0 %v2916_v0 }
  0x4e   : > { %1658 = vmatmul.mubr.msk.bf16.gmra.mrb[24].mxu0 %vm429_vm0, %v1699_v39 }
  0x4f   : > { %556 = vmatprep.mubr.bf16.mxu0 %v2916_v0 }
  0x56   : > { %1659 = vmatmul.mubr.msk.bf16.gmra.mrb[28].mxu0 %vm429_vm0, %v1700_v40 }
  0x90   : > { %v312_v45 = vpop.permute.xlu0 %311  ;;  %v322_v46 = vpop.permute.xlu1 %321 }
  0x94   : > { %v317_v54 = vpop.permute.xlu0 %316  ;;  %v327_v55 = vpop.permute.xlu1 %326 }
  0x98   : > { %v332_v9 = vpop.permute.xlu0 %331  ;;  %v337_v28 = vpop.permute.xlu1 %336 }
  0xf1   : > { %v488_v41 = vpop.f32.mrb[0].mxu0 }
  0xf2   : > { %v490_v42 = vpop.f32.mrb[1].mxu0  ;;  %v2017_v50 = vadd.f32 %v488_v41, %v312_v45 }
  0xf3   : > { %v492_v43 = vpop.f32.mrb[2].mxu0  ;;  %v491_v56 = vadd.f32 %v490_v42, %v312_v45 }
  0xf4   : > { %v494_v44 = vpop.f32.mrb[3].mxu0  ;;  %2932 = vst [vmem:[#allocation2_spill] sm:$0xff] %v2017_v50  ;;  %v2030_v60 = vmul.f32 0.70710677, %v2017_v50  ;;  %v2038_v6 = vadd.f32 %v492_v43, %v317_v54 }
  0xf5   : > { %v2036_v3 = vmul.f32 0.70710677, %v491_v56  ;;  %v495_v15 = vadd.f32 %v494_v44, %v317_v54  ;;  %v2074_v38 = vmul.f32 0.5, %v491_v56 }
  0xf6   : > { %2933 = vst [vmem:[#allocation3_spill] sm:$0xff] %v2030_v60  ;;  %2935 = vst [vmem:[#allocation5_spill] sm:$0xff] %v2038_v6  ;;  %v631_v10 = vand.u32 2147483647, %v2030_v60  ;;  %v1079_v11 = vmul.f32 %v2030_v60, %v2030_v60  ;;  %v2057_v22 = vmul.f32 0.70710677, %v2038_v6 }
  0xf7   : > { %2934 = vst [vmem:[#allocation4_spill] sm:$0xff] %v2036_v3  ;;  %v1080_v19 = vmul.f32 %v2036_v3, %v2036_v3  ;;  %v632_v21 = vand.u32 2147483647, %v2036_v3  ;;  %v2061_v29 = vmul.f32 0.70710677, %v495_v15  ;;  %2938 = vst [vmem:[#allocation8_spill] sm:$0xff] %v2074_v38 }
  0xf8   : > { %2936 = vst [vmem:[#allocation6_spill] sm:$0xff] %v2057_v22  ;;  %v663_v24 = vmul.f32 0.3275911, %v631_v10  ;;  %v1111_v25 = vsub.f32 0.0, %v1079_v11  ;;  %v633_v39 = vand.u32 2147483647, %v2057_v22  ;;  %v1081_v44 = vmul.f32 %v2057_v22, %v2057_v22 }
  0xf9   : > { %v498_v47 = vpop.f32.mrb[4].mxu0  ;;  %2937 = vst [vmem:[#allocation7_spill] sm:$0xff] %v2061_v29  ;;  %v1112_v33 = vsub.f32 0.0, %v1080_v19  ;;  %v664_v43 = vmul.f32 0.3275911, %v632_v21 }
  0xfa   : > { %v2015_v48 = vadd.f32 %v498_v47, %v322_v46  ;;  %v500_v49 = vpop.f32.mrb[5].mxu0  ;;  %v695_v42 = vadd.f32 1.0, %v663_v24  ;;  %v665_v56 = vmul.f32 0.3275911, %v633_v39 }
  0xfb   : > { %v2019_v51 = vadd.f32 %v500_v49, %v322_v46  ;;  %v502_v52 = vpop.f32.mrb[6].mxu0  ;;  %v1143_v46 = vmul.f32 1.442695, %v1111_v25  ;;  %v696_v10 = vadd.f32 1.0, %v664_v43 }
  0xfc   : > { %v504_v53 = vpop.f32.mrb[7].mxu0  ;;  %v2022_v57 = vmul.f32 0.70710677, %v2015_v48  ;;  %v2027_v59 = vadd.f32 %v502_v52, %v327_v55  ;;  %v2088_v52 = vmul.f32 1.442695, %v1112_v33 }
  0xfd   : > { %v2025_v58 = vmul.f32 0.70710677, %v2019_v51  ;;  %v2033_v62 = vadd.f32 %v504_v53, %v327_v55  ;;  %v634_v53 = vand.u32 2147483647, %v2061_v29 }
  0xfe   : > { %v635_v61 = vand.u32 2147483647, %v2022_v57  ;;  %v2041_v8 = vmul.f32 0.70710677, %v2027_v59  ;;  %v1083_v54 = vmul.f32 %v2022_v57, %v2022_v57  ;;  %vm1275_vm1 = vcmp.lt.f32.partialorder %v2022_v57, 0.0 }
  0xff   : > { %v636_v1 = vand.u32 2147483647, %v2025_v58  ;;  %v2047_v13 = vmul.f32 0.70710677, %v2033_v62  ;;  %vm1276_vm2 = vcmp.lt.f32.partialorder %v2025_v58, 0.0 }
 0x100   : > { %v667_v4 = vmul.f32 0.3275911, %v635_v61  ;;  %v637_v17 = vand.u32 2147483647, %v2041_v8  ;;  %v2094_v61 = vmul.f32 0.5, %v495_v15  ;;  %v1115_v19 = vsub.f32 0.0, %v1083_v54 }
 0x101   : > { %v508_v63 = vpop.f32.mrb[8].mxu0  ;;  %v668_v7 = vmul.f32 0.3275911, %v636_v1  ;;  %v638_v20 = vand.u32 2147483647, %v2047_v13  ;;  %vm1277_vm3 = vcmp.lt.f32.partialorder %v2041_v8, 0.0 }
 0x102   : > { %v510_v2 = vpop.f32.mrb[9].mxu0  ;;  %v699_v12 = vadd.f32 1.0, %v667_v4  ;;  %v2050_v18 = vadd.f32 %v508_v63, %v332_v9  ;;  %v669_v23 = vmul.f32 0.3275911, %v637_v17  ;;  %2939 = vst [vmem:[#allocation9_spill] sm:$0xff] %v2094_v61  ;;  %v1113_v4 = vsub.f32 0.0, %v1081_v44 }
 0x103   : > { %v512_v5 = vpop.f32.mrb[10].mxu0  ;;  %v700_v16 = vadd.f32 1.0, %v668_v7  ;;  %v670_v26 = vmul.f32 0.3275911, %v638_v20  ;;  %v2068_v35 = vadd.f32 %v510_v2, %v332_v9  ;;  %v2108_v17 = vmul.f32 0.3275911, %v634_v53 }
 0x104   : > { %v514_v14 = vpop.f32.mrb[11].mxu0  ;;  %1703 = vrcp.f32 %v699_v12  ;;  %v701_v30 = vadd.f32 1.0, %v669_v23  ;;  %v2064_v31 = vmul.f32 0.70710677, %v2050_v18  ;;  %v2070_v36 = vadd.f32 %v512_v5, %v337_v28 }
 0x105   : > { %1705 = vrcp.f32 %v700_v16  ;;  %v702_v34 = vadd.f32 1.0, %v670_v26  ;;  %v2083_v45 = vmul.f32 0.70710677, %v2068_v35  ;;  %v2099_v7 = vadd.f32 %v514_v14, %v337_v28 }
 0x106   : > { %1707 = vrcp.f32 %v701_v30  ;;  %v639_v40 = vand.u32 2147483647, %v2064_v31  ;;  %v2086_v49 = vmul.f32 0.70710677, %v2070_v36  ;;  %v1084_v20 = vmul.f32 %v2025_v58, %v2025_v58 }
 0x107   : > { %1709 = vrcp.f32 %v702_v34  ;;  %v640_v55 = vand.u32 2147483647, %v2083_v45  ;;  %v2116_v23 = vmul.f32 %v2061_v29, %v2061_v29  ;;  %v2121_v30 = vadd.f32 1.0, %v665_v56  ;;  %v2125_v34 = vpop.permute.xlu0 %341 }
 0x108   : > { %v671_v47 = vmul.f32 0.3275911, %v639_v40  ;;  %v641_v1 = vand.u32 2147483647, %v2086_v49  ;;  %1711 = vrcp.f32 %v695_v42  ;;  %v2123_v33 = vmul.f32 1.442695, %v1113_v4 }
 0x109   : > { %v2059_v27 = vpop.f32.mrb[12].mxu0  ;;  %v672_v5 = vmul.f32 0.3275911, %v640_v55  ;;  %v2128_v39 = vmul.f32 0.70710677, %v2099_v7  ;;  %v1085_v44 = vmul.f32 %v2041_v8, %v2041_v8  ;;  %v1116_v53 = vsub.f32 0.0, %v1084_v20 }
 0x10a   : > { %v2066_v32 = vpop.f32.mrb[13].mxu0  ;;  %v703_v63 = vadd.f32 1.0, %v671_v47  ;;  %v673_v12 = vmul.f32 0.3275911, %v641_v1  ;;  %v2137_v47 = vadd.f32 %v2059_v27, %v2125_v34  ;;  %v1151_v1 = vmul.f32 1.442695, %v1115_v19 }
 0x10b   : > { %v2072_v37 = vpop.f32.mrb[14].mxu0  ;;  %v704_v21 = vadd.f32 1.0, %v672_v5  ;;  %v642_v55 = vand.u32 2147483647, %v2128_v39  ;;  %v1086_v5 = vmul.f32 %v2047_v13, %v2047_v13  ;;  %vm1278_vm4 = vcmp.lt.f32.partialorder %v2047_v13, 0.0 }
 0x10c   : > { %v2078_v41 = vpop.f32.mrb[15].mxu0  ;;  %1713 = vrcp.f32 %v703_v63  ;;  %v705_v26 = vadd.f32 1.0, %v673_v12  ;;  %vm1279_vm5 = vcmp.lt.f32.partialorder %v2064_v31, 0.0  ;;  %vm1280_vm6 = vcmp.lt.f32.partialorder %v2083_v45, 0.0 }
 0x10d   : > { %1715 = vrcp.f32 %v704_v21  ;;  %v674_v12 = vmul.f32 0.3275911, %v642_v55  ;;  %vm1281_vm7 = vcmp.lt.f32.partialorder %v2086_v49, 0.0  ;;  %vm1282_vm8 = vcmp.lt.f32.partialorder %v2128_v39, 0.0 }
 0x10e   : > { %v2097_v2 = vpop.eup %1703  ;;  %1717 = vrcp.f32 %v705_v26 }
 0x10f   : > { %v795_v11 = vmul.f32 1.0614054, %v2097_v2  ;;  %v2106_v15 = vpop.eup %1705  ;;  %1719 = vpow2.f32 %v1143_v46  ;;  %v706_v46 = vadd.f32 1.0, %v674_v12 }
 0x110   : > { %v796_v25 = vmul.f32 1.0614054, %v2106_v15  ;;  %v2130_v40 = vpop.eup %1707 }
 0x111   : > { %v2101_v9 = vpop.f32.mrb[16].mxu0  ;;  %v827_v24 = vadd.f32 -1.4531521, %v795_v11  ;;  %v797_v54 = vmul.f32 1.0614054, %v2130_v40  ;;  %v2141_v56 = vpop.eup %1709  ;;  %1721 = vrcp.f32 %v706_v46 }
 0x112   : > { %v2104_v16 = vpop.f32.mrb[17].mxu0  ;;  %v828_v43 = vadd.f32 -1.4531521, %v796_v25  ;;  %v798_v27 = vmul.f32 1.0614054, %v2141_v56  ;;  %v2153_v19 = vpop.eup %1711  ;;  %1723 = vrcp.f32 %v696_v10 }
 0x113   : > { %v2112_v14 = vpop.f32.mrb[18].mxu0  ;;  %v859_v42 = vmul.f32 %v2097_v2, %v827_v24  ;;  %v829_v11 = vadd.f32 -1.4531521, %v797_v54  ;;  %v1117_v24 = vsub.f32 0.0, %v1085_v44  ;;  %v2149_v25 = vmul.f32 0.70710677, %v2137_v47 }
 0x114   : > { %v2119_v28 = vpop.f32.mrb[19].mxu0  ;;  %v860_v4 = vmul.f32 %v2106_v15, %v828_v43  ;;  %2940 = vst [vmem:[#allocation10_spill] sm:$0xff] %v2153_v19  ;;  %v830_v0 = vadd.f32 -1.4531521, %v798_v27  ;;  %v1118_v44 = vsub.f32 0.0, %v1086_v5  ;;  %1725 = vpow2.f32 %v2088_v52 }
 0x115   : > { %v891_v63 = vadd.f32 1.4214138, %v859_v42  ;;  %v1153_v42 = vmul.f32 1.442695, %v1116_v53  ;;  %v861_v43 = vmul.f32 %v2130_v40, %v829_v11  ;;  %v1114_v11 = vsub.f32 0.0, %v2116_v23 }
 0x116   : > { %v892_v21 = vadd.f32 1.4214138, %v860_v4  ;;  %v2158_v6 = vpop.eup %1713  ;;  %v643_v4 = vand.u32 2147483647, %v2149_v25  ;;  %v862_v22 = vmul.f32 %v2141_v56, %v830_v0  ;;  %v1155_v27 = vmul.f32 1.442695, %v1117_v24 }
 0x117   : > { %v923_v20 = vmul.f32 %v2097_v2, %v891_v63  ;;  %v893_v50 = vadd.f32 1.4214138, %v861_v43  ;;  %v799_v60 = vmul.f32 1.0614054, %v2158_v6  ;;  %v1087_v0 = vmul.f32 %v2064_v31, %v2064_v31 }
 0x118   : > { %v924_v63 = vmul.f32 %v2106_v15, %v892_v21  ;;  %v675_v12 = vmul.f32 0.3275911, %v643_v4  ;;  %v894_v21 = vadd.f32 1.4214138, %v862_v22  ;;  %v1157_v46 = vmul.f32 1.442695, %v1118_v44 }
 0x119   : > { %v2151_v26 = vpop.f32.mrb[20].mxu0  ;;  %v955_v55 = vadd.f32 -0.28449672, %v923_v20  ;;  %v2169_v20 = vpop.eup %1715  ;;  %v925_v5 = vmul.f32 %v2130_v40, %v893_v50  ;;  %v831_v43 = vadd.f32 -1.4531521, %v799_v60  ;;  %1727 = vpow2.f32 %v1151_v1 }
 0x11a   : > { %v2156_v54 = vpop.f32.mrb[21].mxu0  ;;  %v800_v10 = vmul.f32 1.0614054, %v2169_v20  ;;  %v707_v38 = vadd.f32 1.0, %v675_v12  ;;  %v2176_v23 = vpop.eup %1717  ;;  %v956_v4 = vadd.f32 -0.28449672, %v924_v63  ;;  %v926_v19 = vmul.f32 %v2141_v56, %v894_v21 }
 0x11b   : > { %v2164_v53 = vpop.f32.mrb[22].mxu0  ;;  %v987_v24 = vmul.f32 %v2097_v2, %v955_v55  ;;  %v863_v50 = vmul.f32 %v2158_v6, %v831_v43  ;;  %v957_v60 = vadd.f32 -0.28449672, %v925_v5  ;;  %v801_v52 = vmul.f32 1.0614054, %v2176_v23  ;;  %v2184_v44 = vpop.eup %1719 }
 0x11c   : > { %2941 = vst [vmem:[#allocation11_spill] sm:$0xff] %v2164_v53  ;;  %v2167_v61 = vpop.f32.mrb[23].mxu0  ;;  %v832_v29 = vadd.f32 -1.4531521, %v800_v10  ;;  %2943 = vst [vmem:[#allocation13_spill] sm:$0xff] %v2184_v44  ;;  %1729 = vpow2.f32 %v1153_v42  ;;  %v1088_v63 = vmul.f32 %v2083_v45, %v2083_v45  ;;  %vm1283_vm9 = vcmp.lt.f32.partialorder %v2149_v25, 0.0 }
 0x11d   : > { %2942 = vst [vmem:[#allocation12_spill] sm:$0xff] %v2167_v61  ;;  %v958_v12 = vadd.f32 -0.28449672, %v926_v19  ;;  %v895_v3 = vadd.f32 1.4214138, %v863_v50  ;;  %v1119_v61 = vsub.f32 0.0, %v1087_v0  ;;  %1731 = vrcp.f32 %v707_v38 }
 0x11e   : > { %v864_v55 = vmul.f32 %v2169_v20, %v832_v29  ;;  %v833_v21 = vadd.f32 -1.4531521, %v801_v52  ;;  %v1019_v5 = vadd.f32 0.2548296, %v987_v24  ;;  %1733 = vpow2.f32 %v1155_v27  ;;  %v2201_v52 = vpop.eup %1721 }
 0x11f   : > { %v927_v43 = vmul.f32 %v2158_v6, %v895_v3  ;;  %v1089_v19 = vmul.f32 %v2086_v49, %v2086_v49  ;;  %v988_v0 = vmul.f32 %v2106_v15, %v956_v4  ;;  %v989_v29 = vmul.f32 %v2130_v40, %v957_v60  ;;  %v2205_v24 = vpop.eup %1723 }
 0x120   : > { %v896_v10 = vadd.f32 1.4214138, %v864_v55  ;;  %v865_v50 = vmul.f32 %v2176_v23, %v833_v21  ;;  %v698_v38 = vadd.f32 1.0, %v2108_v17  ;;  %v990_v27 = vmul.f32 %v2141_v56, %v958_v12  ;;  %2947 = vst [vmem:[#allocation17_spill] sm:$0xff] %v2205_v24  ;;  %v2212_v17 = vpop.eup %1725 }
 0x121   : > { %v2181_v22 = vpop.f32.mrb[24].mxu0  ;;  %1735 = vpow2.f32 %v1157_v46  ;;  %v959_v3 = vadd.f32 -0.28449672, %v927_v43  ;;  %v1159_v44 = vmul.f32 1.442695, %v1119_v61  ;;  %v1121_v55 = vsub.f32 0.0, %v1089_v19 }
 0x122   : > { %v2186_v53 = vpop.f32.mrb[25].mxu0  ;;  %v897_v4 = vadd.f32 1.4214138, %v865_v50  ;;  %1737 = vrcp.f32 %v2121_v30  ;;  %v1149_v60 = vmul.f32 1.442695, %v1114_v11  ;;  %2949 = vst [vmem:[#allocation19_spill] sm:$0xff] %v2212_v17  ;;  %v1051_v46 = vmul.f32 %v2097_v2, %v1019_v5 }
 0x123   : > { %2944 = vst [vmem:[#allocation14_spill] sm:$0xff] %v2186_v53  ;;  %v2191_v1 = vpop.f32.mrb[26].mxu0  ;;  %v802_v21 = vmul.f32 1.0614054, %v2201_v52  ;;  %v1020_v12 = vadd.f32 0.2548296, %v988_v0  ;;  %1739 = vpow2.f32 %v2123_v33  ;;  %v1728_v11 = vpop.eup %1727 }
 0x124   : > { %2945 = vst [vmem:[#allocation15_spill] sm:$0xff] %v2191_v1  ;;  %v2196_v42 = vpop.f32.mrb[27].mxu0  ;;  %v1120_v1 = vsub.f32 0.0, %v1088_v63  ;;  %v1021_v43 = vadd.f32 0.2548296, %v989_v29  ;;  %v929_v61 = vmul.f32 %v2176_v23, %v897_v4  ;;  %1741 = vpow2.f32 %v1159_v44 }
 0x125   : > { %2946 = vst [vmem:[#allocation16_spill] sm:$0xff] %v2196_v42  ;;  %v928_v42 = vmul.f32 %v2169_v20, %v896_v10  ;;  %v1022_v63 = vadd.f32 0.2548296, %v990_v27  ;;  %v991_v10 = vmul.f32 %v2158_v6, %v959_v3  ;;  %v834_v24 = vadd.f32 -1.4531521, %v802_v21 }
 0x126   : > { %v1161_v19 = vmul.f32 1.442695, %v1120_v1  ;;  %v961_v50 = vadd.f32 -0.28449672, %v929_v61  ;;  %1743 = vrcp.f32 %v698_v38  ;;  %v2219_v17 = vmul.f32 0.5, %v2015_v48 }
 0x127   : > { %v960_v30 = vadd.f32 -0.28449672, %v928_v42  ;;  %v2222_v2 = vmul.f32 0.5, %v2019_v51  ;;  %v1163_v5 = vmul.f32 1.442695, %v1121_v55  ;;  %1745 = vpow2.f32 %v1149_v60 }
 0x128   : > { %v2226_v33 = vmul.f32 %v1728_v11, %v1051_v46  ;;  %v1052_v42 = vmul.f32 %v2106_v15, %v1020_v12  ;;  %v1053_v44 = vmul.f32 %v2130_v40, %v1021_v43  ;;  %v1054_v29 = vmul.f32 %v2141_v56, %v1022_v63 }
 0x129   : > { %v2210_v53 = vpop.f32.mrb[28].mxu0  ;;  %v1023_v38 = vadd.f32 0.2548296, %v991_v10  ;;  %v992_v48 = vmul.f32 %v2169_v20, %v960_v30  ;;  %v521_v51 = vadd.f32 %v2066_v32, %v2125_v34  ;;  %v2235_v27 = vmul.f32 0.5, %v2027_v59 }
 0x12a   : > { %2948 = vst [vmem:[#allocation18_spill] sm:$0xff] %v2210_v53  ;;  %v1730_v53 = vpop.eup %1729  ;;  %1747 = vpow2.f32 %v1161_v19  ;;  %v993_v3 = vmul.f32 %v2176_v23, %v961_v50  ;;  %v866_v4 = vmul.f32 %v2201_v52, %v834_v24  ;;  %v2240_v40 = vmul.f32 0.5, %v2033_v62  ;;  %v347_v62 = vpop.permute.xlu1 %346 }
 0x12b   : > { %v2224_v0 = vpop.eup %1731  ;;  %1749 = vpow2.f32 %v1163_v5  ;;  %v1090_v56 = vmul.f32 %v2128_v39, %v2128_v39  ;;  %v1243_v32 = vsub.f32 1.0, %v2226_v33  ;;  %v2247_v59 = vmul.f32 %v1730_v53, %v1052_v42 }
 0x12c   : > { %v1734_v1 = vpop.eup %1733  ;;  %v803_v60 = vmul.f32 1.0614054, %v2224_v0  ;;  %v2252_v24 = vmul.f32 0.5, %v2050_v18  ;;  %v1055_v46 = vmul.f32 %v2158_v6, %v1023_v38  ;;  %v1024_v12 = vadd.f32 0.2548296, %v992_v48 }
 0x12d   : > { %v1736_v15 = vpop.eup %1735  ;;  %v2249_v34 = vmul.f32 %v1734_v1, %v1053_v44  ;;  %v2257_v43 = vmul.f32 0.70710677, %v521_v51  ;;  %v2260_v61 = vmul.f32 0.5, %v2068_v35  ;;  %v1025_v63 = vadd.f32 0.2548296, %v993_v3 }
 0x12e   : > { %v2254_v55 = vpop.eup %1737  ;;  %v1214_v21 = vmul.f32 %v1736_v15, %v1054_v29  ;;  %v898_v53 = vadd.f32 1.4214138, %v866_v4  ;;  %v2263_v10 = vadd.f32 %v2072_v37, %v347_v62  ;;  %v1122_v18 = vsub.f32 0.0, %v1090_v56 }
 0x12f   : > { %2950 = vst [vmem:[#allocation20_spill] sm:$0xff] %v2254_v55  ;;  %v2265_v30 = vpop.eup %1739  ;;  %v835_v11 = vadd.f32 -1.4531521, %v803_v60  ;;  %v1091_v6 = vmul.f32 %v2149_v25, %v2149_v25  ;;  %v644_v19 = vand.u32 2147483647, %v2257_v43  ;;  %v1244_v50 = vsub.f32 1.0, %v2247_v59  ;;  %v352_v55 = vpop.permute.xlu0 %351 }
 0x130   : > { %2951 = vst [vmem:[#allocation21_spill] sm:$0xff] %v2265_v30  ;;  %v1742_v35 = vpop.eup %1741  ;;  %v1245_v5 = vsub.f32 1.0, %v2249_v34  ;;  %v2276_v37 = vmul.f32 0.5, %v2070_v36  ;;  %v2279_v33 = vmul.f32 0.5, %v2099_v7  ;;  %v1307_v44 = vsub.f32 0.0, %v1243_v32  ;;  %v2958_v25 = vld [vmem:[#allocation11_spill] sm:$0xff] }
 0x131   : > { %v2281_v42 = vpop.eup %1743  ;;  %v1246_v1 = vsub.f32 1.0, %v1214_v21  ;;  %v2283_v29 = vmul.f32 %v1742_v35, %v1055_v46  ;;  %v1056_v38 = vmul.f32 %v2169_v20, %v1024_v12  ;;  %v1057_v3 = vmul.f32 %v2176_v23, %v1025_v63  ;;  %v2299_v23 = vpop.f32.mrb[29].mxu0 }
 0x132   : > { %v2286_v48 = vpop.eup %1745  ;;  %v930_v4 = vmul.f32 %v2201_v52, %v898_v53  ;;  %v676_v15 = vmul.f32 0.3275911, %v644_v19  ;;  %v2291_v36 = vmul.f32 0.70710677, %v2263_v10  ;;  %v1165_v7 = vmul.f32 1.442695, %v1122_v18 }
 0x133   : > { %2952 = vst [vmem:[#allocation22_spill] sm:$0xff] %v2286_v48  ;;  %v2294_v56 = vmul.f32 0.5, %v2137_v47  ;;  %v867_v60 = vmul.f32 %v2224_v0, %v835_v11  ;;  %v1123_v59 = vsub.f32 0.0, %v1091_v6  ;;  %v1308_v21 = vsub.f32 0.0, %v1244_v50 }
 0x134   : > { %v1748_v34 = vpop.eup %1747  ;;  %v1309_v20 = vsub.f32 0.0, %v1245_v5  ;;  %v2297_v46 = vmul.f32 0.5, %v521_v51  ;;  %v708_v12 = vadd.f32 1.0, %v676_v15  ;;  %v1339_v53 = vsel %vm1275_vm1, %v1307_v44, %v1243_v32 }
 0x135   : > { %v1750_v63 = vpop.eup %1749  ;;  %v1310_v19 = vsub.f32 0.0, %v1246_v1  ;;  %v1247_v18 = vsub.f32 1.0, %v2283_v29  ;;  %v645_v47 = vand.u32 2147483647, %v2291_v36  ;;  %v1216_v11 = vmul.f32 %v1748_v34, %v1056_v38 }
 0x136   : > { %v1217_v6 = vmul.f32 %v1750_v63, %v1057_v3  ;;  %v962_v35 = vadd.f32 -0.28449672, %v930_v4  ;;  %1751 = vrcp.f32 %v708_v12  ;;  %v899_v51 = vadd.f32 1.4214138, %v867_v60 }
 0x137   : > { %1753 = vpow2.f32 %v1165_v7  ;;  %v1167_v15 = vmul.f32 1.442695, %v1123_v59  ;;  %v677_v30 = vmul.f32 0.3275911, %v645_v47  ;;  %v1371_v48 = vadd.f32 1.0, %v1339_v53 }
 0x138   : > { %v1340_v57 = vsel %vm1276_vm2, %v1308_v21, %v1244_v50  ;;  %v1341_v32 = vsel %vm1277_vm3, %v1309_v20, %v1245_v5  ;;  %v2311_v44 = vadd.f32 %v2078_v41, %v347_v62  ;;  %v1342_v29 = vsel %vm1278_vm4, %v1310_v19, %v1246_v1 }
 0x139   : > { %v1311_v38 = vsub.f32 0.0, %v1247_v18  ;;  %v709_v3 = vadd.f32 1.0, %v677_v30  ;;  %v2317_v4 = vadd.f32 %v2101_v9, %v352_v55  ;;  %v1248_v7 = vsub.f32 1.0, %v1216_v11 }
 0x13a   : > { %v1249_v60 = vsub.f32 1.0, %v1217_v6  ;;  %v994_v58 = vmul.f32 %v2201_v52, %v962_v35  ;;  %v2322_v8 = vmul.f32 0.70710677, %v2311_v44  ;;  %v931_v41 = vmul.f32 %v2224_v0, %v899_v51 }
 0x13b   : > { %1755 = vrcp.f32 %v709_v3  ;;  %v2326_v13 = vmul.f32 0.70710677, %v2317_v4  ;;  %v2329_v62 = vadd.f32 %v2104_v16, %v352_v55  ;;  %v1372_v9 = vadd.f32 1.0, %v1340_v57 }
 0x13c   : > { %v1373_v30 = vadd.f32 1.0, %v1341_v32  ;;  %v1374_v50 = vadd.f32 1.0, %v1342_v29  ;;  %v646_v5 = vand.u32 2147483647, %v2322_v8  ;;  %v2333_v1 = vmul.f32 %v1371_v48, %v2219_v17  ;;  %v357_v32 = vpop.permute.xlu1 %356 }
 0x13d   : > { %1757 = vpow2.f32 %v1167_v15  ;;  %v1092_v59 = vmul.f32 %v2257_v43, %v2257_v43  ;;  %v647_v34 = vand.u32 2147483647, %v2326_v13  ;;  %v1312_v21 = vsub.f32 0.0, %v1248_v7 }
 0x13e   : > { %2953 = vst [vmem:[#allocation23_spill] sm:$0xff] %v2333_v1  ;;  %v1313_v20 = vsub.f32 0.0, %v1249_v60  ;;  %v1026_v12 = vadd.f32 0.2548296, %v994_v58  ;;  %v678_v63 = vmul.f32 0.3275911, %v646_v5  ;;  %v1343_v16 = vsel %vm1279_vm5, %v1311_v38, %v1247_v18 }
 0x13f   : > { %v963_v55 = vadd.f32 -0.28449672, %v931_v41  ;;  %v679_v53 = vmul.f32 0.3275911, %v647_v34  ;;  %v2341_v19 = vmul.f32 0.70710677, %v2329_v62  ;;  %v2346_v48 = vmul.f32 %v1372_v9, %v2222_v2 }
 0x140   : > { %v2343_v17 = vpop.eup %1751  ;;  %v2349_v47 = vmul.f32 %v1373_v30, %v2235_v27  ;;  %v2352_v11 = vmul.f32 %v1374_v50, %v2240_v40  ;;  %v710_v6 = vadd.f32 1.0, %v678_v63  ;;  %v1124_v18 = vsub.f32 0.0, %v1092_v59 }
 0x141   : > { %v1754_v35 = vpop.eup %1753  ;;  %v804_v31 = vmul.f32 1.0614054, %v2343_v17  ;;  %v1093_v51 = vmul.f32 %v2291_v36, %v2291_v36  ;;  %v711_v15 = vadd.f32 1.0, %v679_v53  ;;  %v1375_v57 = vadd.f32 1.0, %v1343_v16 }
 0x142   : > { %2954 = vst [vmem:[#allocation24_spill] sm:$0xff] %v2349_v47  ;;  %v1344_v2 = vsel %vm1280_vm6, %v1312_v21, %v1248_v7  ;;  %1759 = vrcp.f32 %v710_v6  ;;  %v648_v27 = vand.u32 2147483647, %v2341_v19  ;;  %v1345_v40 = vsel %vm1281_vm7, %v1313_v20, %v1249_v60 }
 0x143   : > { %v1058_v29 = vmul.f32 %v2201_v52, %v1026_v12  ;;  %v995_v38 = vmul.f32 %v2224_v0, %v963_v55  ;;  %v836_v3 = vadd.f32 -1.4531521, %v804_v31  ;;  %1761 = vrcp.f32 %v711_v15  ;;  %v362_v31 = vpop.permute.xlu0 %361 }
 0x144   : > { %v680_v58 = vmul.f32 0.3275911, %v648_v27  ;;  %v2365_v41 = vadd.f32 %v2112_v14, %v357_v32  ;;  %v2368_v45 = vadd.f32 %v2119_v28, %v357_v32  ;;  %v1376_v9 = vadd.f32 1.0, %v1344_v2 }
 0x145   : > { %v2370_v7 = vpop.eup %1755  ;;  %v868_v30 = vmul.f32 %v2343_v17, %v836_v3  ;;  %v1169_v49 = vmul.f32 1.442695, %v1124_v18  ;;  %v1125_v60 = vsub.f32 0.0, %v1093_v51  ;;  %v1377_v50 = vadd.f32 1.0, %v1345_v40 }
 0x146   : > { %v805_v52 = vmul.f32 1.0614054, %v2370_v7  ;;  %v712_v5 = vadd.f32 1.0, %v680_v58  ;;  %v2375_v59 = vmul.f32 0.70710677, %v2365_v41  ;;  %v2377_v14 = vmul.f32 %v1754_v35, %v1058_v29  ;;  %v2407_v29 = vpop.f32.mrb[30].mxu0 }
 0x147   : > { %v1758_v34 = vpop.eup %1757  ;;  %v1027_v21 = vadd.f32 0.2548296, %v995_v38  ;;  %v2380_v28 = vmul.f32 0.5, %v2263_v10  ;;  %v2383_v20 = vmul.f32 0.70710677, %v2368_v45  ;;  %v2387_v55 = vmul.f32 %v1375_v57, %v2252_v24 }
 0x148   : > { %v900_v12 = vadd.f32 1.4214138, %v868_v30  ;;  %v837_v63 = vadd.f32 -1.4531521, %v805_v52  ;;  %1763 = vrcp.f32 %v712_v5  ;;  %v649_v16 = vand.u32 2147483647, %v2375_v59 }
 0x149   : > { %2955 = vst [vmem:[#allocation25_spill] sm:$0xff] %v2387_v55  ;;  %v2390_v53 = vmul.f32 %v1376_v9, %v2260_v61  ;;  %v1171_v6 = vmul.f32 1.442695, %v1125_v60  ;;  %v650_v35 = vand.u32 2147483647, %v2383_v20  ;;  %v2394_v10 = vmul.f32 %v1377_v50, %v2276_v37 }
 0x14a   : > { %1765 = vpow2.f32 %v1169_v49  ;;  %v869_v18 = vmul.f32 %v2370_v7, %v837_v63  ;;  %v681_v51 = vmul.f32 0.3275911, %v649_v16  ;;  %v1059_v15 = vmul.f32 %v2224_v0, %v1027_v21  ;;  %v2422_v49 = vpop.f32.mrb[31].mxu0 }
 0x14b   : > { %2956 = vst [vmem:[#allocation26_spill] sm:$0xff] %v2390_v53  ;;  %2957 = vst [vmem:[#allocation27_spill] sm:$0xff] %v2394_v10  ;;  %v1094_v24 = vmul.f32 %v2322_v8, %v2322_v8  ;;  %v682_v57 = vmul.f32 0.3275911, %v650_v35  ;;  %v2401_v61 = vadd.f32 %v2151_v26, %v362_v31  ;;  %v1250_v27 = vsub.f32 1.0, %v2377_v14  ;;  %v367_v53 = vpop.permute.xlu1 %366 }
 0x14c   : > { %v2403_v2 = vpop.eup %1759  ;;  %v932_v37 = vmul.f32 %v2343_v17, %v900_v12  ;;  %v901_v32 = vadd.f32 1.4214138, %v869_v18  ;;  %v713_v40 = vadd.f32 1.0, %v681_v51  ;;  %1767 = vpow2.f32 %v1171_v6 }
 0x14d   : > { %v2411_v0 = vmul.f32 0.5, %v2311_v44  ;;  %v806_v38 = vmul.f32 1.0614054, %v2403_v2  ;;  %v714_v26 = vadd.f32 1.0, %v682_v57  ;;  %v2414_v3 = vpop.eup %1761  ;;  %v1095_v9 = vmul.f32 %v2326_v13, %v2326_v13 }
 0x14e   : > { %v933_v58 = vmul.f32 %v2370_v7, %v901_v32  ;;  %1769 = vrcp.f32 %v713_v40  ;;  %v2420_v30 = vmul.f32 0.70710677, %v2401_v61  ;;  %v2424_v60 = vmul.f32 %v1758_v34, %v1059_v15 }
 0x14f   : > { %v838_v44 = vadd.f32 -1.4531521, %v806_v38  ;;  %v1126_v50 = vsub.f32 0.0, %v1094_v24  ;;  %v807_v52 = vmul.f32 1.0614054, %v2414_v3  ;;  %v1096_v14 = vmul.f32 %v2341_v19, %v2341_v19 }
 0x150   : > { %v964_v5 = vadd.f32 -0.28449672, %v932_v37  ;;  %1771 = vrcp.f32 %v714_v26  ;;  %v651_v21 = vand.u32 2147483647, %v2420_v30  ;;  %v1314_v12 = vsub.f32 0.0, %v1250_v27 }
 0x151   : > { %v965_v63 = vadd.f32 -0.28449672, %v933_v58  ;;  %v870_v16 = vmul.f32 %v2403_v2, %v838_v44  ;;  %v839_v6 = vadd.f32 -1.4531521, %v807_v52  ;;  %v2434_v34 = vmul.f32 0.5, %v2317_v4 }
 0x152   : > { %v2431_v35 = vpop.eup %1763  ;;  %v1127_v18 = vsub.f32 0.0, %v1095_v9  ;;  %v683_v51 = vmul.f32 0.3275911, %v651_v21  ;;  %v2437_v15 = vadd.f32 %v2156_v54, %v362_v31  ;;  %v1251_v24 = vsub.f32 1.0, %v2424_v60 }
 0x153   : > { %v902_v57 = vadd.f32 1.4214138, %v870_v16  ;;  %v871_v37 = vmul.f32 %v2414_v3, %v839_v6  ;;  %v808_v32 = vmul.f32 1.0614054, %v2431_v35  ;;  %v996_v38 = vmul.f32 %v2343_v17, %v964_v5 }
 0x154   : > { %v1766_v40 = vpop.eup %1765  ;;  %v1173_v26 = vmul.f32 1.442695, %v1126_v50  ;;  %v1128_v58 = vsub.f32 0.0, %v1096_v14  ;;  %v715_v44 = vadd.f32 1.0, %v683_v51  ;;  %v997_v4 = vmul.f32 %v2370_v7, %v965_v63 }
 0x155   : > { %v934_v54 = vmul.f32 %v2403_v2, %v902_v57  ;;  %v903_v31 = vadd.f32 1.4214138, %v871_v37  ;;  %v840_v9 = vadd.f32 -1.4531521, %v808_v32  ;;  %v1346_v60 = vsel %vm1282_vm8, %v1314_v12, %v1250_v27 }
 0x156   : > { %v1175_v52 = vmul.f32 1.442695, %v1127_v18  ;;  %1773 = vrcp.f32 %v715_v44  ;;  %v2449_v21 = vmul.f32 0.70710677, %v2437_v15  ;;  %v1768_v5 = vpop.eup %1767  ;;  %v1315_v50 = vsub.f32 0.0, %v1251_v24 }
 0x157   : > { %v966_v14 = vadd.f32 -0.28449672, %v934_v54  ;;  %v935_v16 = vmul.f32 %v2414_v3, %v903_v31  ;;  %v872_v6 = vmul.f32 %v2431_v35, %v840_v9  ;;  %v1028_v51 = vadd.f32 0.2548296, %v996_v38 }
 0x158   : > { %v2453_v63 = vpop.eup %1769  ;;  %1775 = vpow2.f32 %v1173_v26  ;;  %v1177_v57 = vmul.f32 1.442695, %v1128_v58  ;;  %v652_v39 = vand.u32 2147483647, %v2449_v21  ;;  %v1029_v27 = vadd.f32 0.2548296, %v997_v4 }
 0x159   : > { %v998_v12 = vmul.f32 %v2403_v2, %v966_v14  ;;  %v967_v18 = vadd.f32 -0.28449672, %v935_v16  ;;  %v904_v37 = vadd.f32 1.4214138, %v872_v6  ;;  %1777 = vpow2.f32 %v1175_v52 }
 0x15a   : > { %v2457_v32 = vpop.eup %1771  ;;  %v809_v44 = vmul.f32 1.0614054, %v2453_v63  ;;  %v1097_v54 = vmul.f32 %v2375_v59, %v2375_v59  ;;  %v684_v31 = vmul.f32 0.3275911, %v652_v39  ;;  %v1098_v4 = vmul.f32 %v2383_v20, %v2383_v20 }
 0x15b   : > { %v999_v38 = vmul.f32 %v2414_v3, %v967_v18  ;;  %v936_v26 = vmul.f32 %v2431_v35, %v904_v37  ;;  %v810_v58 = vmul.f32 1.0614054, %v2457_v32  ;;  %v1060_v9 = vmul.f32 %v2343_v17, %v1028_v51 }
 0x15c   : > { %1779 = vpow2.f32 %v1177_v57  ;;  %v841_v14 = vadd.f32 -1.4531521, %v809_v44  ;;  %v716_v52 = vadd.f32 1.0, %v684_v31  ;;  %v1061_v16 = vmul.f32 %v2370_v7, %v1029_v27 }
 0x15d   : > { %v1030_v6 = vadd.f32 0.2548296, %v998_v12  ;;  %v968_v10 = vadd.f32 -0.28449672, %v936_v26  ;;  %v842_v55 = vadd.f32 -1.4531521, %v810_v58  ;;  %v1347_v39 = vsel %vm1283_vm9, %v1315_v50, %v1251_v24 }
 0x15e   : > { %v873_v18 = vmul.f32 %v2453_v63, %v841_v14  ;;  %v1129_v37 = vsub.f32 0.0, %v1097_v54  ;;  %1781 = vrcp.f32 %v716_v52  ;;  %v1031_v47 = vadd.f32 0.2548296, %v999_v38 }
 0x15f   : > { %v1000_v1 = vmul.f32 %v2431_v35, %v968_v10  ;;  %v1130_v17 = vsub.f32 0.0, %v1098_v4  ;;  %v1099_v51 = vmul.f32 %v2420_v30, %v2420_v30  ;;  %v1378_v7 = vadd.f32 1.0, %v1346_v60 }
 0x160   : > { %v2475_v57 = vpop.eup %1773  ;;  %v905_v27 = vadd.f32 1.4214138, %v873_v18  ;;  %v874_v12 = vmul.f32 %v2457_v32, %v842_v55  ;;  %v2479_v24 = vadd.f32 %v2958_v25, %v367_v53  ;;  %v1379_v50 = vadd.f32 1.0, %v1347_v39 }
 0x161   : > { %v1220_v44 = vmul.f32 %v1766_v40, %v1060_v9  ;;  %v1221_v54 = vmul.f32 %v1768_v5, %v1061_v16  ;;  %v1062_v31 = vmul.f32 %v2403_v2, %v1030_v6  ;;  %v1032_v10 = vadd.f32 0.2548296, %v1000_v1 }
 0x162   : > { %v1776_v38 = vpop.eup %1775  ;;  %v937_v26 = vmul.f32 %v2453_v63, %v905_v27  ;;  %v906_v58 = vadd.f32 1.4214138, %v874_v12  ;;  %v811_v4 = vmul.f32 1.0614054, %v2475_v57  ;;  %v1063_v60 = vmul.f32 %v2414_v3, %v1031_v47 }
 0x163   : > { %v1179_v14 = vmul.f32 1.442695, %v1129_v37  ;;  %v1181_v52 = vmul.f32 1.442695, %v1130_v17  ;;  %v1131_v55 = vsub.f32 0.0, %v1099_v51  ;;  %v1778_v18 = vpop.eup %1777  ;;  %vm1284_vm10 = vcmp.lt.f32.partialorder %v2257_v43, 0.0 }
 0x164   : > { %v969_v39 = vadd.f32 -0.28449672, %v937_v26  ;;  %v938_v40 = vmul.f32 %v2457_v32, %v906_v58  ;;  %v843_v5 = vadd.f32 -1.4531521, %v811_v4  ;;  %v2488_v2 = vmul.f32 0.70710677, %v2479_v24 }
 0x165   : > { %v2491_v1 = vmul.f32 %v1378_v7, %v2279_v33  ;;  %v1252_v9 = vsub.f32 1.0, %v1220_v44  ;;  %v1253_v16 = vsub.f32 1.0, %v1221_v54  ;;  %vm1285_vm11 = vcmp.lt.f32.partialorder %v2291_v36, 0.0 }
 0x166   : > { %v2495_v47 = vmul.f32 0.5, %v2329_v62  ;;  %v1780_v3 = vpop.eup %1779  ;;  %v1222_v6 = vmul.f32 %v1776_v38, %v1062_v31  ;;  %v1064_v37 = vmul.f32 %v2431_v35, %v1032_v10  ;;  %v970_v17 = vadd.f32 -0.28449672, %v938_v40 }
 0x167   : > { %v875_v51 = vmul.f32 %v2475_v57, %v843_v5  ;;  %v2500_v27 = vmul.f32 %v1379_v50, %v2294_v56  ;;  %v1001_v33 = vmul.f32 %v2453_v63, %v969_v39  ;;  %1783 = vpow2.f32 %v1179_v14 }
 0x168   : > { %v653_v7 = vand.u32 2147483647, %v2488_v2  ;;  %v2504_v12 = vpop.eup %1781  ;;  %v1223_v25 = vmul.f32 %v1778_v18, %v1063_v60  ;;  %v2507_v62 = vmul.f32 0.5, %v2365_v41  ;;  %1785 = vpow2.f32 %v1181_v52  ;;  %v2959_v60 = vld [vmem:[#allocation12_spill] sm:$0xff] }
 0x169   : > { %v1183_v44 = vmul.f32 1.442695, %v1131_v55  ;;  %v1316_v35 = vsub.f32 0.0, %v1252_v9  ;;  %v1002_v54 = vmul.f32 %v2457_v32, %v970_v17  ;;  %v907_v31 = vadd.f32 1.4214138, %v875_v51  ;;  %v372_v17 = vpop.permute.xlu0 %371 }
 0x16a   : > { %v812_v56 = vmul.f32 1.0614054, %v2504_v12  ;;  %v1317_v50 = vsub.f32 0.0, %v1253_v16  ;;  %v1254_v38 = vsub.f32 1.0, %v1222_v6  ;;  %vm1286_vm12 = vcmp.lt.f32.partialorder %v2322_v8, 0.0 }
 0x16b   : > { %v1224_v10 = vmul.f32 %v1780_v3, %v1064_v37  ;;  %v685_v26 = vmul.f32 0.3275911, %v653_v7  ;;  %vm1287_vm13 = vcmp.lt.f32.partialorder %v2326_v13, 0.0  ;;  %v1033_v58 = vadd.f32 0.2548296, %v1001_v33 }
 0x16c   : > { %v939_v41 = vmul.f32 %v2475_v57, %v907_v31  ;;  %v844_v4 = vadd.f32 -1.4531521, %v812_v56  ;;  %v2515_v14 = vadd.f32 %v2959_v60, %v367_v53  ;;  %v1255_v52 = vsub.f32 1.0, %v1223_v25 }
 0x16d   : > { %1787 = vpow2.f32 %v1183_v44  ;;  %v1100_v55 = vmul.f32 %v2449_v21, %v2449_v21  ;;  %v717_v18 = vadd.f32 1.0, %v685_v26  ;;  %v1348_v39 = vsel %vm1284_vm10, %v1316_v35, %v1252_v9 }
 0x16e   : > { %v1034_v40 = vadd.f32 0.2548296, %v1002_v54  ;;  %v971_v5 = vadd.f32 -0.28449672, %v939_v41  ;;  %v876_v3 = vmul.f32 %v2504_v12, %v844_v4  ;;  %v1349_v6 = vsel %vm1285_vm11, %v1317_v50, %v1253_v16 }
 0x16f   : > { %v1318_v37 = vsub.f32 0.0, %v1254_v38  ;;  %vm1288_vm14 = vcmp.lt.f32.partialorder %v2341_v19, 0.0  ;;  %v2526_v53 = vmul.f32 0.5, %v2368_v45  ;;  %1789 = vrcp.f32 %v717_v18 }
 0x170   : > { %v1256_v51 = vsub.f32 1.0, %v1224_v10  ;;  %v1065_v33 = vmul.f32 %v2453_v63, %v1033_v58  ;;  %v908_v43 = vadd.f32 1.4214138, %v876_v3  ;;  %v2530_v9 = vmul.f32 0.70710677, %v2515_v14 }
 0x171   : > { %v1380_v7 = vadd.f32 1.0, %v1348_v39  ;;  %v1319_v25 = vsub.f32 0.0, %v1255_v52  ;;  %v1003_v36 = vmul.f32 %v2475_v57, %v971_v5  ;;  %v2534_v16 = vadd.f32 %v2181_v22, %v372_v17  ;;  %v1784_v44 = vpop.eup %1783 }
 0x172   : > { %v1066_v45 = vmul.f32 %v2457_v32, %v1034_v40  ;;  %v940_v35 = vmul.f32 %v2504_v12, %v908_v43  ;;  %v1132_v54 = vsub.f32 0.0, %v1100_v55  ;;  %v654_v31 = vand.u32 2147483647, %v2530_v9  ;;  %v1786_v63 = vpop.eup %1785 }
 0x173   : > { %v1381_v56 = vadd.f32 1.0, %v1349_v6  ;;  %v2540_v50 = vmul.f32 0.5, %v2401_v61  ;;  %v2543_v10 = vmul.f32 0.5, %v2437_v15  ;;  %v1101_v22 = vmul.f32 %v2488_v2, %v2488_v2  ;;  %v2960_v61 = vld [vmem:[#allocation14_spill] sm:$0xff] }
 0x174   : > { %v1350_v26 = vsel %vm1286_vm12, %v1318_v37, %v1254_v38  ;;  %v1320_v32 = vsub.f32 0.0, %v1256_v51  ;;  %v1225_v58 = vmul.f32 %v1784_v44, %v1065_v33  ;;  %v686_v41 = vmul.f32 0.3275911, %v654_v31 }
 0x175   : > { %v1351_v4 = vsel %vm1287_vm13, %v1319_v25, %v1255_v52  ;;  %v1035_v60 = vadd.f32 0.2548296, %v1003_v36  ;;  %v2552_v55 = vmul.f32 0.70710677, %v2534_v16  ;;  %v2555_v18 = vadd.f32 %v2960_v61, %v372_v17 }
 0x176   : > { %v2558_v15 = vmul.f32 %v1380_v7, %v2297_v46  ;;  %v1226_v39 = vmul.f32 %v1786_v63, %v1066_v45  ;;  %v972_v40 = vadd.f32 -0.28449672, %v940_v35  ;;  %v1185_v8 = vmul.f32 1.442695, %v1132_v54 }
 0x177   : > { %v1788_v38 = vpop.eup %1787  ;;  %v2561_v5 = vmul.f32 %v1381_v56, %v2380_v28  ;;  %vm1289_vm15 = vcmp.lt.f32.partialorder %v2375_v59, 0.0  ;;  %v1133_v13 = vsub.f32 0.0, %v1101_v22  ;;  %v718_v52 = vadd.f32 1.0, %v686_v41  ;;  %v377_v56 = vpop.permute.xlu1 %376 }
 0x178   : > { %v655_v3 = vand.u32 2147483647, %v2552_v55  ;;  %v1382_v6 = vadd.f32 1.0, %v1350_v26  ;;  %v1383_v37 = vadd.f32 1.0, %v1351_v4  ;;  %v1352_v17 = vsel %vm1288_vm14, %v1320_v32, %v1256_v51  ;;  %v2961_v4 = vld [vmem:[#allocation15_spill] sm:$0xff] }
 0x179   : > { %v1257_v46 = vsub.f32 1.0, %v1225_v58  ;;  %v2567_v33 = vpop.eup %1789  ;;  %vm1290_vm0 = vcmp.lt.f32.partialorder %v2383_v20, 0.0  ;;  %v1067_v43 = vmul.f32 %v2475_v57, %v1035_v60  ;;  %1791 = vrcp.f32 %v718_v52 }
 0x17a   : > { %v687_v28 = vmul.f32 0.3275911, %v655_v3  ;;  %v2572_v7 = vmul.f32 0.70710677, %v2555_v18  ;;  %v1258_v25 = vsub.f32 1.0, %v1226_v39  ;;  %v1004_v36 = vmul.f32 %v2504_v12, %v972_v40  ;;  %v2962_v39 = vld [vmem:[#allocation16_spill] sm:$0xff] }
 0x17b   : > { %1793 = vpow2.f32 %v1185_v8  ;;  %v813_v44 = vmul.f32 1.0614054, %v2567_v33  ;;  %v2577_v19 = vmul.f32 0.5, %v2479_v24  ;;  %v1187_v51 = vmul.f32 1.442695, %v1133_v13 }
 0x17c   : > { %v719_v45 = vadd.f32 1.0, %v687_v28  ;;  %v656_v35 = vand.u32 2147483647, %v2572_v7  ;;  %v2581_v57 = vmul.f32 %v1382_v6, %v2411_v0  ;;  %v1384_v54 = vadd.f32 1.0, %v1352_v17 }
 0x17d   : > { %v1321_v31 = vsub.f32 0.0, %v1257_v46  ;;  %v845_v63 = vadd.f32 -1.4531521, %v813_v44  ;;  %v2584_v22 = vmul.f32 %v1383_v37, %v2434_v34  ;;  %v1227_v26 = vmul.f32 %v1788_v38, %v1067_v43 }
 0x17e   : > { %1795 = vrcp.f32 %v719_v45  ;;  %v688_v32 = vmul.f32 0.3275911, %v656_v35  ;;  %v1322_v58 = vsub.f32 0.0, %v1258_v25  ;;  %v1036_v24 = vadd.f32 0.2548296, %v1004_v36  ;;  %v2963_v36 = vld [vmem:[#allocation18_spill] sm:$0xff] }
 0x17f   : > { %v1102_v41 = vmul.f32 %v2530_v9, %v2530_v9  ;;  %v2589_v60 = vadd.f32 %v2961_v4, %v377_v56  ;;  %v877_v0 = vmul.f32 %v2567_v33, %v845_v63  ;;  %1797 = vpow2.f32 %v1187_v51 }
 0x180   : > { %v720_v61 = vadd.f32 1.0, %v688_v32  ;;  %v2593_v40 = vadd.f32 %v2962_v39, %v377_v56  ;;  %v2596_v34 = vmul.f32 %v1384_v54, %v2495_v47  ;;  %v1353_v8 = vsel %vm1289_vm15, %v1321_v31, %v1257_v46  ;;  %v2613_v47 = vpop.permute.xlu0 %381 }
 0x181   : > { %vm1291_vm1 = vcmp.lt.f32.partialorder %v2420_v30, 0.0  ;;  %v2602_v38 = vmul.f32 0.5, %v2515_v14  ;;  %v2605_v13 = vmul.f32 0.70710677, %v2589_v60  ;;  %v1259_v52 = vsub.f32 1.0, %v1227_v26 }
 0x182   : > { %v2608_v3 = vmul.f32 0.5, %v2534_v16  ;;  %1799 = vrcp.f32 %v720_v61  ;;  %v2611_v6 = vmul.f32 0.70710677, %v2593_v40  ;;  %v1354_v59 = vsel %vm1290_vm0, %v1322_v58, %v1258_v25 }
 0x183   : > { %v1068_v37 = vmul.f32 %v2504_v12, %v1036_v24  ;;  %v1134_v14 = vsub.f32 0.0, %v1102_v41  ;;  %v657_v17 = vand.u32 2147483647, %v2605_v13  ;;  %v2619_v46 = vpop.eup %1791  ;;  %v909_v43 = vadd.f32 1.4214138, %v877_v0 }
 0x184   : > { %v1103_v16 = vmul.f32 %v2552_v55, %v2552_v55  ;;  %v658_v28 = vand.u32 2147483647, %v2611_v6  ;;  %v2626_v44 = vadd.f32 %v2963_v36, %v2613_v47  ;;  %v1385_v20 = vadd.f32 1.0, %v1353_v8 }
 0x185   : > { %v1794_v51 = vpop.eup %1793  ;;  %v814_v25 = vmul.f32 1.0614054, %v2619_v46  ;;  %v2630_v12 = vmul.f32 0.5, %v2555_v18  ;;  %v689_v45 = vmul.f32 0.3275911, %v657_v17  ;;  %v1386_v35 = vadd.f32 1.0, %v1354_v59 }
 0x186   : > { %2964 = vst [vmem:[#allocation11_spill] sm:$0xff] %v2626_v44  ;;  %v1323_v54 = vsub.f32 0.0, %v1259_v52  ;;  %v1104_v31 = vmul.f32 %v2572_v7, %v2572_v7  ;;  %v690_v63 = vmul.f32 0.3275911, %v658_v28  ;;  %v1228_v56 = vmul.f32 %v1794_v51, %v1068_v37 }
 0x187   : > { %v846_v26 = vadd.f32 -1.4531521, %v814_v25  ;;  %v1189_v32 = vmul.f32 1.442695, %v1134_v14  ;;  %v721_v58 = vadd.f32 1.0, %v689_v45  ;;  %v941_v41 = vmul.f32 %v2567_v33, %v909_v43 }
 0x188   : > { %v2634_v24 = vpop.eup %1795  ;;  %v1135_v4 = vsub.f32 0.0, %v1103_v16  ;;  %v722_v0 = vadd.f32 1.0, %v690_v63  ;;  %v2638_v18 = vmul.f32 0.70710677, %v2626_v44  ;;  %v2641_v61 = vmul.f32 %v1385_v20, %v2507_v62  ;;  %v2965_v63 = vld [vmem:[#allocation17_spill] sm:$0xff] }
 0x189   : > { %v878_v39 = vmul.f32 %v2619_v46, %v846_v26  ;;  %v815_v8 = vmul.f32 1.0614054, %v2634_v24  ;;  %1801 = vrcp.f32 %v721_v58  ;;  %v2645_v59 = vpop.eup %1797  ;;  %v2648_v37 = vmul.f32 %v1386_v35, %v2526_v53 }
 0x18a   : > { %v1355_v14 = vsel %vm1291_vm1, %v1323_v54, %v1259_v52  ;;  %vm1292_vm2 = vcmp.lt.f32.partialorder %v2449_v21, 0.0  ;;  %v1136_v17 = vsub.f32 0.0, %v1104_v31  ;;  %v659_v43 = vand.u32 2147483647, %v2638_v18 }
 0x18b   : > { %v1260_v62 = vsub.f32 1.0, %v1228_v56  ;;  %v910_v16 = vadd.f32 1.4214138, %v878_v39  ;;  %v847_v28 = vadd.f32 -1.4531521, %v815_v8  ;;  %1803 = vrcp.f32 %v722_v0 }
 0x18c   : > { %v2654_v36 = vpop.eup %1799  ;;  %v973_v51 = vadd.f32 -0.28449672, %v941_v41  ;;  %1805 = vpow2.f32 %v1189_v32  ;;  %v1191_v20 = vmul.f32 1.442695, %v1135_v4  ;;  %v691_v25 = vmul.f32 0.3275911, %v659_v43 }
 0x18d   : > { %v942_v53 = vmul.f32 %v2619_v46, %v910_v16  ;;  %v879_v30 = vmul.f32 %v2634_v24, %v847_v28  ;;  %v816_v52 = vmul.f32 1.0614054, %v2654_v36  ;;  %v1105_v45 = vmul.f32 %v2605_v13, %v2605_v13 }
 0x18e   : > { %v2661_v35 = vadd.f32 1.0, %v1355_v14  ;;  %v1193_v54 = vmul.f32 1.442695, %v1136_v17  ;;  %v723_v31 = vadd.f32 1.0, %v691_v25  ;;  %v792_v56 = vmul.f32 1.0614054, %v2965_v63 }
 0x18f   : > { %v1324_v26 = vsub.f32 0.0, %v1260_v62  ;;  %v974_v58 = vadd.f32 -0.28449672, %v942_v53  ;;  %v911_v32 = vadd.f32 1.4214138, %v879_v30  ;;  %v1106_v41 = vmul.f32 %v2611_v6, %v2611_v6 }
 0x190   : > { %v1005_v4 = vmul.f32 %v2567_v33, %v973_v51  ;;  %v848_v0 = vadd.f32 -1.4531521, %v816_v52  ;;  %v794_v39 = vmul.f32 1.0614054, %v2281_v42  ;;  %v824_v8 = vadd.f32 -1.4531521, %v792_v56 }
 0x191   : > { %v1006_v43 = vmul.f32 %v2619_v46, %v974_v58  ;;  %v943_v14 = vmul.f32 %v2634_v24, %v911_v32  ;;  %1807 = vpow2.f32 %v1191_v20  ;;  %v1137_v17 = vsub.f32 0.0, %v1105_v45 }
 0x192   : > { %v880_v16 = vmul.f32 %v2654_v36, %v848_v0  ;;  %1809 = vrcp.f32 %v723_v31  ;;  %v826_v28 = vadd.f32 -1.4531521, %v794_v39  ;;  %v856_v25 = vmul.f32 %v2965_v63, %v824_v8 }
 0x193   : > { %v2672_v53 = vpop.eup %1801  ;;  %v1356_v51 = vsel %vm1292_vm2, %v1324_v26, %v1260_v62  ;;  %v975_v30 = vadd.f32 -0.28449672, %v943_v14  ;;  %1811 = vpow2.f32 %v1193_v54  ;;  %v1138_v52 = vsub.f32 0.0, %v1106_v41 }
 0x194   : > { %v1037_v56 = vadd.f32 0.2548296, %v1005_v4  ;;  %v912_v58 = vadd.f32 1.4214138, %v880_v16  ;;  %v817_v32 = vmul.f32 1.0614054, %v2672_v53  ;;  %v858_v20 = vmul.f32 %v2281_v42, %v826_v28 }
 0x195   : > { %v2678_v45 = vpop.eup %1803  ;;  %v1038_v31 = vadd.f32 0.2548296, %v1006_v43  ;;  %v1007_v0 = vmul.f32 %v2634_v24, %v975_v30  ;;  %v888_v39 = vadd.f32 1.4214138, %v856_v25  ;;  %v2683_v8 = vadd.f32 %v2299_v23, %v2613_v47 }
 0x196   : > { %v1806_v21 = vpop.eup %1805  ;;  %v944_v62 = vmul.f32 %v2654_v36, %v912_v58  ;;  %v849_v54 = vadd.f32 -1.4531521, %v817_v32  ;;  %v1195_v26 = vmul.f32 1.442695, %v1137_v17  ;;  %v818_v41 = vmul.f32 1.0614054, %v2678_v45 }
 0x197   : > { %v1039_v4 = vadd.f32 0.2548296, %v1007_v0  ;;  %v1197_v14 = vmul.f32 1.442695, %v1138_v52  ;;  %v890_v16 = vadd.f32 1.4214138, %v858_v20  ;;  %v920_v28 = vmul.f32 %v2965_v63, %v888_v39 }
 0x198   : > { %v1069_v43 = vmul.f32 %v2567_v33, %v1037_v56  ;;  %v976_v30 = vadd.f32 -0.28449672, %v944_v62  ;;  %v881_v25 = vmul.f32 %v2672_v53, %v849_v54  ;;  %v850_v44 = vadd.f32 -1.4531521, %v818_v41 }
 0x199   : > { %v1070_v23 = vmul.f32 %v2619_v46, %v1038_v31  ;;  %v922_v47 = vmul.f32 %v2281_v42, %v890_v16  ;;  %v952_v58 = vadd.f32 -0.28449672, %v920_v28  ;;  %v2693_v17 = vmul.f32 0.70710677, %v2683_v8 }
 0x19a   : > { %v1071_v32 = vmul.f32 %v2634_v24, %v1039_v4  ;;  %v1008_v52 = vmul.f32 %v2654_v36, %v976_v30  ;;  %v913_v20 = vadd.f32 1.4214138, %v881_v25  ;;  %v882_v0 = vmul.f32 %v2678_v45, %v850_v44 }
 0x19b   : > { %v1808_v33 = vpop.eup %1807  ;;  %v1388_v56 = vadd.f32 1.0, %v1356_v51  ;;  %v2699_v39 = vmul.f32 0.5, %v2589_v60  ;;  %1813 = vpow2.f32 %v1195_v26  ;;  %v954_v46 = vadd.f32 -0.28449672, %v922_v47 }
 0x19c   : > { %v2701_v31 = vpop.eup %1809  ;;  %v1229_v62 = vmul.f32 %v2645_v59, %v1069_v43  ;;  %v945_v54 = vmul.f32 %v2672_v53, %v913_v20  ;;  %v914_v41 = vadd.f32 1.4214138, %v882_v0  ;;  %v984_v24 = vmul.f32 %v2965_v63, %v952_v58 }
 0x19d   : > { %v1812_v4 = vpop.eup %1811  ;;  %v1230_v16 = vmul.f32 %v1806_v21, %v1070_v23  ;;  %v1040_v28 = vadd.f32 0.2548296, %v1008_v52  ;;  %1815 = vpow2.f32 %v1197_v14  ;;  %v986_v44 = vmul.f32 %v2281_v42, %v954_v46 }
 0x19e   : > { %v1231_v51 = vmul.f32 %v1808_v33, %v1071_v32  ;;  %v977_v60 = vadd.f32 -0.28449672, %v945_v54  ;;  %v946_v26 = vmul.f32 %v2678_v45, %v914_v41  ;;  %v660_v30 = vand.u32 2147483647, %v2693_v17 }
 0x19f   : > { %v2711_v59 = vmul.f32 %v2661_v35, %v2540_v50  ;;  %vm1293_vm3 = vcmp.lt.f32.partialorder %v2488_v2, 0.0  ;;  %v819_v43 = vmul.f32 1.0614054, %v2701_v31  ;;  %v1016_v25 = vadd.f32 0.2548296, %v984_v24 }
 0x1a0   : > { %v1018_v21 = vadd.f32 0.2548296, %v986_v44  ;;  %v1261_v23 = vsub.f32 1.0, %v1229_v62  ;;  %v1009_v14 = vmul.f32 %v2672_v53, %v977_v60  ;;  %v2717_v47 = vmul.f32 0.5, %v2593_v40  ;;  %v2966_v62 = vld [vmem:[#allocation19_spill] sm:$0xff] }
 0x1a1   : > { %v978_v58 = vadd.f32 -0.28449672, %v946_v26  ;;  %v2720_v32 = vmul.f32 %v1388_v56, %v2543_v10  ;;  %vm1294_vm4 = vcmp.lt.f32.partialorder %v2530_v9, 0.0  ;;  %v1072_v50 = vmul.f32 %v2654_v36, %v1040_v28  ;;  %v2967_v10 = vld [vmem:[#allocation22_spill] sm:$0xff]  ;;  %v387_v9 = vpop.permute.xlu1 %386 }
 0x1a2   : > { %v1048_v35 = vmul.f32 %v2965_v63, %v1016_v25  ;;  %v1050_v52 = vmul.f32 %v2281_v42, %v1018_v21  ;;  %v1262_v20 = vsub.f32 1.0, %v1230_v16  ;;  %v1263_v0 = vsub.f32 1.0, %v1231_v51  ;;  %v2968_v25 = vld [vmem:[#allocation4_spill] sm:$0xff]  ;;  %v2969_v21 = vld [vmem:[#allocation7_spill] sm:$0xff] }
 0x1a3   : > { %vm1295_vm5 = vcmp.lt.f32.partialorder %v2552_v55, 0.0  ;;  %v1041_v33 = vadd.f32 0.2548296, %v1009_v14  ;;  %v1010_v40 = vmul.f32 %v2678_v45, %v978_v58  ;;  %v851_v46 = vadd.f32 -1.4531521, %v819_v43 }
 0x1a4   : > { %v1208_v54 = vmul.f32 %v2966_v62, %v1048_v35  ;;  %v1210_v56 = vmul.f32 %v2967_v10, %v1050_v52  ;;  %v692_v41 = vmul.f32 0.3275911, %v660_v30  ;;  %v1325_v24 = vsub.f32 0.0, %v1261_v23  ;;  %v2970_v62 = vld [vmem:[#allocation10_spill] sm:$0xff] }
 0x1a5   : > { %v1073_v36 = vmul.f32 %v2672_v53, %v1041_v33  ;;  %v1042_v28 = vadd.f32 0.2548296, %v1010_v40  ;;  %v1107_v42 = vmul.f32 %v2638_v18, %v2638_v18  ;;  %v1814_v63 = vpop.eup %1813  ;;  %v1232_v16 = vmul.f32 %v1812_v4, %v1072_v50 }
 0x1a6   : > { %v1240_v44 = vsub.f32 1.0, %v1208_v54  ;;  %v1242_v51 = vsub.f32 1.0, %v1210_v56  ;;  %v724_v60 = vadd.f32 1.0, %v692_v41  ;;  %v1326_v26 = vsub.f32 0.0, %v1262_v20 }
 0x1a7   : > { %v1074_v43 = vmul.f32 %v2678_v45, %v1042_v28  ;;  %vm1272_vm6 = vcmp.lt.f32.partialorder %v2968_v25, 0.0  ;;  %vm1274_vm7 = vcmp.lt.f32.partialorder %v2969_v21, 0.0  ;;  %v1816_v30 = vpop.eup %1815  ;;  %v1327_v14 = vsub.f32 0.0, %v1263_v0 }
 0x1a8   : > { %v883_v53 = vmul.f32 %v2701_v31, %v851_v46  ;;  %v1304_v58 = vsub.f32 0.0, %v1240_v44  ;;  %v1306_v35 = vsub.f32 0.0, %v1242_v51  ;;  %v1357_v52 = vsel %vm1293_vm3, %v1325_v24, %v1261_v23 }
 0x1a9   : > { %vm1296_vm8 = vcmp.lt.f32.partialorder %v2572_v7, 0.0  ;;  %v1233_v4 = vmul.f32 %v1814_v63, %v1073_v36  ;;  %v1234_v50 = vmul.f32 %v1816_v30, %v1074_v43  ;;  %1817 = vrcp.f32 %v724_v60  ;;  %v2971_v36 = vld [vmem:[#allocation20_spill] sm:$0xff]  ;;  %v2973_v60 = vld [vmem:[#allocation9_spill] sm:$0xff] }
 0x1aa   : > { %v1264_v33 = vsub.f32 1.0, %v1232_v16  ;;  %v1336_v45 = vsel %vm1272_vm6, %v1304_v58, %v1240_v44  ;;  %v1338_v40 = vsel %vm1274_vm7, %v1306_v35, %v1242_v51  ;;  %v791_v54 = vmul.f32 1.0614054, %v2970_v62  ;;  %v2972_v44 = vld [vmem:[#allocation8_spill] sm:$0xff] }
 0x1ab   : > { %v1358_v10 = vsel %vm1294_vm4, %v1326_v26, %v1262_v20  ;;  %v1139_v56 = vsub.f32 0.0, %v1107_v42  ;;  %v1368_v46 = vadd.f32 1.0, %v1336_v45  ;;  %v1370_v41 = vadd.f32 1.0, %v1338_v40 }
 0x1ac   : > { %v1359_v2 = vsel %vm1295_vm5, %v1327_v14, %v1263_v0  ;;  %vm1297_vm9 = vcmp.lt.f32.partialorder %v2605_v13, 0.0  ;;  %v1266_v23 = vsub.f32 1.0, %v1234_v50  ;;  %v915_v24 = vadd.f32 1.4214138, %v883_v53 }
 0x1ad   : > { %v793_v28 = vmul.f32 1.0614054, %v2971_v36  ;;  %v1389_v63 = vadd.f32 1.0, %v1357_v52  ;;  %v1265_v16 = vsub.f32 1.0, %v1233_v4  ;;  %v1400_v51 = vmul.f32 %v1368_v46, %v2972_v44 }
 0x1ae   : > { %v1402_v43 = vmul.f32 %v1370_v41, %v2973_v60  ;;  %v1390_v20 = vadd.f32 1.0, %v1358_v10  ;;  %v1328_v42 = vsub.f32 0.0, %v1264_v33  ;;  %vm1298_vm10 = vcmp.lt.f32.partialorder %v2611_v6, 0.0  ;;  %v2974_v60 = vld [vmem:[#allocation23_spill] sm:$0xff]  ;;  %v2975_v6 = vld [vmem:[#allocation24_spill] sm:$0xff] }
 0x1af   : > { %v823_v26 = vadd.f32 -1.4531521, %v791_v54  ;;  %v1391_v55 = vadd.f32 1.0, %v1359_v2  ;;  %v825_v25 = vadd.f32 -1.4531521, %v793_v28  ;;  %v2751_v21 = vadd.f32 %v2407_v29, %v387_v9 }
 0x1b0   : > { %v1436_v0 = vpack.c.bf16 %v1402_v43, %v1400_v51  ;;  %v1330_v30 = vsub.f32 0.0, %v1266_v23  ;;  %v947_v14 = vmul.f32 %v2701_v31, %v915_v24  ;;  %v2754_v53 = vmul.f32 1.442695, %v1139_v56 }
 0x1b1   : > { %v855_v58 = vmul.f32 %v2970_v62, %v823_v26  ;;  %v2758_v35 = vmul.f32 %v1389_v63, %v2577_v19  ;;  %v1329_v52 = vsub.f32 0.0, %v1265_v16  ;;  %v857_v4 = vmul.f32 %v2971_v36, %v825_v25 }
 0x1b2   : > { %1487 = vmatprep.subr.bf16.mxu1 %v1436_v0  ;;  %v2762_v50 = vmul.f32 0.70710677, %v2751_v21  ;;  %v1360_v29 = vsel %vm1296_vm8, %v1328_v42, %v1264_v33  ;;  %v2767_v40 = vadd.f32 %v2422_v49, %v387_v9  ;;  %v1438_v54 = vpack.c.bf16 %v2352_v11, %v2346_v48 }
 0x1b3   : > { %v887_v45 = vadd.f32 1.4214138, %v855_v58  ;;  %v2771_v10 = vpop.eup %1817  ;;  %v2774_v19 = vmul.f32 %v1390_v20, %v2602_v38  ;;  %v2777_v56 = vmul.f32 %v1391_v55, %v2608_v3  ;;  %v889_v46 = vadd.f32 1.4214138, %v857_v4 }
 0x1b4   : > { %v661_v41 = vand.u32 2147483647, %v2762_v50  ;;  %v1362_v7 = vsel %vm1298_vm10, %v1330_v30, %v1266_v23  ;;  %v979_v33 = vadd.f32 -0.28449672, %v947_v14  ;;  %v820_v49 = vmul.f32 1.0614054, %v2771_v10 }
 0x1b5   : > { %v919_v2 = vmul.f32 %v2970_v62, %v887_v45  ;;  %v1392_v24 = vadd.f32 1.0, %v1360_v29  ;;  %v1361_v28 = vsel %vm1297_vm9, %v1329_v52, %v1265_v16  ;;  %v921_v38 = vmul.f32 %v2971_v36, %v889_v46  ;;  %v2976_v30 = vld [vmem:[#allocation26_spill] sm:$0xff] }
 0x1b6   : > { %v693_v63 = vmul.f32 0.3275911, %v661_v41  ;;  %v852_v3 = vadd.f32 -1.4531521, %v820_v49  ;;  %v2788_v51 = vmul.f32 0.70710677, %v2767_v40  ;;  %v1437_v23 = vpack.c.bf16 %v2975_v6, %v2974_v60 }
 0x1b7   : > { %v951_v44 = vadd.f32 -0.28449672, %v919_v2  ;;  %v1394_v43 = vadd.f32 1.0, %v1362_v7  ;;  %v1108_v9 = vmul.f32 %v2693_v17, %v2693_v17  ;;  %v953_v20 = vadd.f32 -0.28449672, %v921_v38  ;;  %v2977_v41 = vld [vmem:[#allocation25_spill] sm:$0xff] }
 0x1b8   : > { %v725_v42 = vadd.f32 1.0, %v693_v63  ;;  %v1393_v26 = vadd.f32 1.0, %v1361_v28  ;;  %v884_v13 = vmul.f32 %v2771_v10, %v852_v3  ;;  %v662_v55 = vand.u32 2147483647, %v2788_v51  ;;  %v2978_v7 = vld [vmem:[#allocation27_spill] sm:$0xff] }
 0x1b9   : > { %v983_v16 = vmul.f32 %v2970_v62, %v951_v44  ;;  %v1011_v0 = vmul.f32 %v2701_v31, %v979_v33  ;;  %v985_v25 = vmul.f32 %v2971_v36, %v953_v20  ;;  %v2802_v58 = vmul.f32 %v1392_v24, %v2630_v12  ;;  %v2980_v20 = vld [vmem:[#allocation21_spill] sm:$0xff] }
 0x1ba   : > { %1819 = vrcp.f32 %v725_v42  ;;  %v916_v52 = vadd.f32 1.4214138, %v884_v13  ;;  %v694_v29 = vmul.f32 0.3275911, %v662_v55  ;;  %v2805_v45 = vmul.f32 %v1394_v43, %v2717_v47  ;;  %v2979_v43 = vld [vmem:[#allocation13_spill] sm:$0xff] }
 0x1bb   : > { %v1015_v4 = vadd.f32 0.2548296, %v983_v16  ;;  %v1017_v46 = vadd.f32 0.2548296, %v985_v25  ;;  %v2812_v2 = vmul.f32 %v1393_v26, %v2699_v39  ;;  %v1140_v44 = vsub.f32 0.0, %v1108_v9  ;;  %v2983_v9 = vld [vmem:[#allocation2_spill] sm:$0xff] }
 0x1bc   : > { %v726_v12 = vadd.f32 1.0, %v694_v29  ;;  %v948_v38 = vmul.f32 %v2771_v10, %v916_v52  ;;  %v1109_v26 = vmul.f32 %v2762_v50, %v2762_v50  ;;  %v2987_v60 = vpack.c.bf16 %v2581_v57, %v2558_v15 }
 0x1bd   : > { %v1047_v28 = vmul.f32 %v2970_v62, %v1015_v4  ;;  %v1049_v47 = vmul.f32 %v2971_v36, %v1017_v46  ;;  %v1201_v52 = vmul.f32 1.442695, %v1140_v44  ;;  %v2981_v46 = vld [vmem:[#allocation3_spill] sm:$0xff]  ;;  %v567_v36 = vmul.f32 0.5, %v2983_v9 }
 0x1be   : > { %1821 = vrcp.f32 %v726_v12  ;;  %v980_v55 = vadd.f32 -0.28449672, %v948_v38  ;;  %vm1271_vm11 = vcmp.lt.f32.partialorder %v2981_v46, 0.0  ;;  %vm1299_vm13 = vcmp.lt.f32.partialorder %v2638_v18, 0.0  ;;  %v2990_v18 = vld [vmem:[#allocation11_spill] sm:$0xff] }
 0x1bf   : > { %v1207_v39 = vmul.f32 %v2979_v43, %v1047_v28  ;;  %v1209_v42 = vmul.f32 %v2980_v20, %v1049_v47  ;;  %1823 = vpow2.f32 %v2754_v53  ;;  %v1043_v28 = vadd.f32 0.2548296, %v1011_v0  ;;  %v2982_v43 = vld [vmem:[#allocation6_spill] sm:$0xff] }
 0x1c0   : > { %v1141_v47 = vsub.f32 0.0, %v1109_v26  ;;  %vm1273_vm12 = vcmp.lt.f32.partialorder %v2982_v43, 0.0  ;;  %v1012_v53 = vmul.f32 %v2771_v10, %v980_v55  ;;  %1825 = vpow2.f32 %v1201_v52 }
 0x1c1   : > { %v1239_v16 = vsub.f32 1.0, %v1207_v39  ;;  %v1241_v25 = vsub.f32 1.0, %v1209_v42  ;;  %v1110_v39 = vmul.f32 %v2788_v51, %v2788_v51  ;;  %v2984_v42 = vld [vmem:[#allocation5_spill] sm:$0xff]  ;;  %v1075_v26 = vmul.f32 %v2701_v31, %v1043_v28 }
 0x1c2   : > { %v569_v62 = vmul.f32 0.5, %v2984_v42  ;;  %v1203_v3 = vmul.f32 1.442695, %v1141_v47  ;;  %v1044_v33 = vadd.f32 0.2548296, %v1012_v53  ;;  %vm1301_vm14 = vcmp.lt.f32.partialorder %v2762_v50, 0.0 }
 0x1c3   : > { %v1303_v4 = vsub.f32 0.0, %v1239_v16  ;;  %v1305_v12 = vsub.f32 0.0, %v1241_v25  ;;  %v1142_v24 = vsub.f32 0.0, %v1110_v39  ;;  %vm1300_vm15 = vcmp.lt.f32.partialorder %v2693_v17, 0.0 }
 0x1c4   : > { %v1820_v29 = vpop.eup %1819  ;;  %1827 = vpow2.f32 %v1203_v3  ;;  %vm1302_vm0 = vcmp.lt.f32.partialorder %v2788_v51, 0.0  ;;  %v2993_v17 = vpack.c.bf16 %v2758_v35, %v2711_v59  ;;  %v2995_v51 = vpack.c.bf16 %v2812_v2, %v2777_v56  ;;  %v1701_v35 = vld [vmem:[%s2913_s3] sm:$0xff]  }
 0x1c5   : > { %v1335_v20 = vsel %vm1271_vm11, %v1303_v4, %v1239_v16  ;;  %v821_v13 = vmul.f32 1.0614054, %v1820_v29  ;;  %v1337_v38 = vsel %vm1273_vm12, %v1305_v12, %v1241_v25 }
 0x1c6   : > { %v1367_v44 = vadd.f32 1.0, %v1335_v20  ;;  %v1369_v46 = vadd.f32 1.0, %v1337_v38  ;;  %v1205_v20 = vmul.f32 1.442695, %v1142_v24 }
 0x1c7   : > { %v853_v0 = vadd.f32 -1.4531521, %v821_v13  ;;  %v1076_v13 = vmul.f32 %v2771_v10, %v1044_v33  ;;  %v2985_v10 = vpack.c.bf16 %v2491_v1, %v2976_v30 }
 0x1c8   : > { %v1822_v43 = vpop.eup %1821  ;;  %v1399_v16 = vmul.f32 %v1367_v44, %v567_v36  ;;  %v1401_v4 = vmul.f32 %v1369_v46, %v569_v62  ;;  %1829 = vpow2.f32 %v1205_v20  ;;  %v595_v46 = vmul.f32 0.5, %v2990_v18 }
 0x1c9   : > { %v885_v63 = vmul.f32 %v1820_v29, %v853_v0  ;;  %v822_v49 = vmul.f32 1.0614054, %v1822_v43  ;;  %v1824_v55 = vpop.eup %1823 }
 0x1ca   : > { %v1435_v9 = vpack.c.bf16 %v1401_v4, %v1399_v16  ;;  %v1235_v12 = vmul.f32 %v1824_v55, %v1075_v26  ;;  %v1826_v28 = vpop.eup %1825  ;;  %v597_v26 = vmul.f32 0.5, %v2751_v21 }
 0x1cb   : > { %v917_v14 = vadd.f32 1.4214138, %v885_v63  ;;  %v854_v25 = vadd.f32 -1.4531521, %v822_v49  ;;  %v1236_v49 = vmul.f32 %v1826_v28, %v1076_v13 }
 0x1cc   : > { %1488 = vmatpush1.bf16.msra.mxu1 %v1435_v9  ;;  %v1267_v47 = vsub.f32 1.0, %v1235_v12 }
 0x1cd   : > { %v949_v52 = vmul.f32 %v1820_v29, %v917_v14  ;;  %v886_v31 = vmul.f32 %v1822_v43, %v854_v25  ;;  %1489 = vmatprep.subr.bf16.mxu1 %v1438_v54  ;;  %v2986_v54 = vpack.c.bf16 %v2978_v7, %v2977_v41  ;;  %v1268_v3 = vsub.f32 1.0, %v1236_v49 }
 0x1ce   : > { %v1331_v48 = vsub.f32 0.0, %v1267_v47  ;;  %v1828_v63 = vpop.eup %1827  ;;  %v2989_v7 = vpack.c.bf16 %v2648_v37, %v2596_v34 }
 0x1cf   : > { %v981_v62 = vadd.f32 -0.28449672, %v949_v52  ;;  %v918_v36 = vadd.f32 1.4214138, %v886_v31  ;;  %v1332_v38 = vsub.f32 0.0, %v1268_v3  ;;  %v1463_v52 = vpop.permute.xlu1 %1462 }
 0x1d0   : > { %1490 = vmatpush1.bf16.msra.mxu1 %v1437_v23  ;;  %v1363_v23 = vsel %vm1299_vm13, %v1331_v48, %v1267_v47 }
 0x1d1   : > { %v1013_v39 = vmul.f32 %v1820_v29, %v981_v62  ;;  %v950_v14 = vmul.f32 %v1822_v43, %v918_v36  ;;  %1491 = vmatprep.subr.bf16.mxu1 %v2985_v10  ;;  %v1395_v15 = vadd.f32 1.0, %v1363_v23 }
 0x1d2   : > { %v1830_v44 = vpop.eup %1829 }
 0x1d3   : > { %v1045_v33 = vadd.f32 0.2548296, %v1013_v39  ;;  %v982_v24 = vadd.f32 -0.28449672, %v950_v14  ;;  %v1427_v50 = vmul.f32 %v1395_v15, %v595_v46  ;;  %v1473_v14 = vpop.permute.xlu1 %1472 }
 0x1d4   : > { %1492 = vmatpush1.bf16.msra.mxu1 %v2986_v54 }
 0x1d5   : > { %v1077_v11 = vmul.f32 %v1820_v29, %v1045_v33  ;;  %v1014_v53 = vmul.f32 %v1822_v43, %v982_v24  ;;  %1493 = vmatprep.subr.bf16.mxu1 %v2987_v60  ;;  %v2988_v29 = vpack.c.bf16 %v2561_v5, %v2500_v27  ;;  %v2991_v27 = vpack.c.bf16 %v2641_v61, %v2584_v22 }
 0x1d6   : > { %v1364_v5 = vsel %vm1300_vm15, %v1332_v38, %v1268_v3  ;;  %v2994_v61 = vpack.c.bf16 %v2805_v45, %v2802_v58  ;;  %v2996_v58 = vmov 0  }
 0x1d7   : > { %v1237_v6 = vmul.f32 %v1828_v63, %v1077_v11  ;;  %v1046_v1 = vadd.f32 0.2548296, %v1014_v53  ;;  %v1396_v9 = vadd.f32 1.0, %v1364_v5 }
 0x1d8   : > { %1494 = vmatpush1.bf16.msra.mxu1 %v2988_v29 }
 0x1d9   : > { %v1269_v30 = vsub.f32 1.0, %v1237_v6  ;;  %v1078_v41 = vmul.f32 %v1822_v43, %v1046_v1  ;;  %1495 = vmatprep.subr.bf16.mxu1 %v2989_v7  ;;  %v2992_v43 = vpack.c.bf16 %v2774_v19, %v2720_v32  ;;  %v596_v32 = vmul.f32 0.5, %v2683_v8  ;;  %v1702_v8 = vld [vmem:[%s2913_s3 + $0x8] sm:$0xff]  }
 0x1da   : > { %v598_v19 = vmul.f32 0.5, %v2767_v40  ;;  %v1458_v40 = vpop.permute.xlu0 %1457 }
 0x1db   : > { %v1333_v42 = vsub.f32 0.0, %v1269_v30  ;;  %v1238_v57 = vmul.f32 %v1830_v44, %v1078_v41  ;;  %v1428_v25 = vmul.f32 %v1396_v9, %v596_v32 }
 0x1dc   : > { %1496 = vmatpush1.bf16.msra.mxu1 %v2991_v27 }
 0x1dd   : > { %v1365_v0 = vsel %vm1301_vm14, %v1333_v42, %v1269_v30  ;;  %v1270_v37 = vsub.f32 1.0, %v1238_v57  ;;  %1497 = vmatprep.subr.bf16.mxu1 %v2992_v43 }
 0x1de   : > { %v1397_v34 = vadd.f32 1.0, %v1365_v0  ;;  %v1468_v28 = vpop.permute.xlu0 %1467 }
 0x1df   : > { %v1334_v4 = vsub.f32 0.0, %v1270_v37 }
 0x1e0   : > { %v1429_v16 = vmul.f32 %v1397_v34, %v597_v26  ;;  %1498 = vmatpush1.bf16.msra.mxu1 %v2993_v17 }
 0x1e1   : > { %v1366_v22 = vsel %vm1302_vm0, %v1334_v4, %v1270_v37  ;;  %1499 = vmatprep.subr.bf16.mxu1 %v2994_v61 }
 0x1e2   : > { %v1449_v21 = vpack.c.bf16 %v1429_v16, %v1427_v50  ;;  %v1398_v55 = vadd.f32 1.0, %v1366_v22 }
 0x1e4   : > { %v1430_v12 = vmul.f32 %v1398_v55, %v598_v19  ;;  %1500 = vmatpush1.bf16.msra.mxu1 %v2995_v51 }
 0x1e6   : > { %v1450_v59 = vpack.c.bf16 %v1430_v12, %v1428_v25 }
 0x1e8   : > { %1501 = vmatprep.subr.bf16.mxu1 %v1450_v59 }
 0x1e9   : > { %1502 = vmatpush1.bf16.msra.mxu1 %v1449_v21 }
 0x1ec   : > { %1520 = vmatmul.mubr.bf16.vlgmr.msra.gmra.mrb[0].mxu1 %v1701_v35 }
 0x1ed   : > { %1529 = vmatprep.mubr.bf16.mxu1 %v2996_v58 }
 0x1f4   : > { %1530 = vmatmul.mubr.bf16.gmra.mrb[4].mxu1 %v1702_v8 }
 0x2bf   : > { %v1521_v56 = vpop.f32.mrb[0].mxu1 }
 0x2c0   : > { %v1522_v45 = vadd.f32 %v1521_v56, %v1458_v40  ;;  %v1523_v2 = vpop.f32.mrb[1].mxu1 }
 0x2c1   : > { %v1524_v20 = vadd.f32 %v1523_v2, %v1458_v40  ;;  %v1525_v13 = vpop.f32.mrb[2].mxu1 }
 0x2c2   : > { %1540 = vst [vmem:[%s262_s28] sm:$0xff] %v1522_v45  ;;  %v1526_v31 = vadd.f32 %v1525_v13, %v1463_v52  ;;  %v1527_v62 = vpop.f32.mrb[3].mxu1 }
 0x2c3   : > { %1541 = vst [vmem:[%s262_s28 + $0x8] sm:$0xff] %v1524_v20  ;;  %v1528_v36 = vadd.f32 %v1527_v62, %v1463_v52 }
 0x2c4   : > { %1542 = vst [vmem:[%s262_s28 + $0x10] sm:$0xff] %v1526_v31 }
 0x2c5   : > { %1543 = vst [vmem:[%s262_s28 + $0x18] sm:$0xff] %v1528_v36 }
 0x2c7   : > { %v1531_v47 = vpop.f32.mrb[4].mxu1 }
 0x2c8   : > { %v1532_v39 = vadd.f32 %v1531_v47, %v1468_v28  ;;  %v1533_v49 = vpop.f32.mrb[5].mxu1 }
 0x2c9   : > { %v1534_v10 = vadd.f32 %v1533_v49, %v1468_v28  ;;  %v1535_v33 = vpop.f32.mrb[6].mxu1 }
 0x2ca   : > { %1544 = vst [vmem:[%s262_s28 + $0x20] sm:$0xff] %v1532_v39  ;;  %v1536_v24 = vadd.f32 %v1535_v33, %v1473_v14  ;;  %v1537_v48 = vpop.f32.mrb[7].mxu1 }
 0x2cb   : > { %1545 = vst [vmem:[%s262_s28 + $0x28] sm:$0xff] %v1534_v10  ;;  %v1538_v11 = vadd.f32 %v1537_v48, %v1473_v14 }
 0x2cc   : > { %1546 = vst [vmem:[%s262_s28 + $0x30] sm:$0xff] %v1536_v24 }
 0x2cd   : > { %1547 = vst [vmem:[%s262_s28 + $0x38] sm:$0xff] %v1538_v11 }
 0x2ce PF: > { %s15_s20 = sadd.s32 1, %s1853_s20   ;;  %s2997_s18 = smov %s1849_s19 }
 0x2cf   : > { %p12_p5 = scmp.ge.s32.totalorder %s15_s20, 4   ;;  %s2998_s19 = smov %s3000_s21 }
 0x2d1   :  { %14 = sbr.rel (!%p12_p5) target bundleno = 2 (0x2), region = 70 }

</bundles_post_ra>
